<compile_context>
chip_gen: v7x
topology: tpu7x:2x2x1
jax: 0.10.0
libtpu: 0.0.40
codegen_flags: <defaults>
</compile_context>

<pallas_src>
import functools
import math

import jax
import jax.numpy as jnp
from jax.experimental import pallas as pl
from jax.experimental.pallas import tpu as pltpu


# ---------------------------------------------------------------------------
# Optional single-buffering of constant-index (weight) blocks.
# ---------------------------------------------------------------------------
_SINGLE_BUFFER_WEIGHTS = False


def probe_single_buffer_support():
    """Eagerly (outside jit) check whether pipeline_mode=pl.Buffered(1) works."""
    global _SINGLE_BUFFER_WEIGHTS
    try:
        spec = pl.BlockSpec((8, 128), lambda i: (0, 0),
                            pipeline_mode=pl.Buffered(1))

        def _k(x_ref, o_ref):
            o_ref[...] = x_ref[...] + 1.0

        fn = pl.pallas_call(
            _k,
            out_shape=jax.ShapeDtypeStruct((8, 128), jnp.float32),
            grid=(2,),
            in_specs=[spec],
            out_specs=pl.BlockSpec((8, 128), lambda i: (0, 0)),
        )
        out = jax.block_until_ready(fn(jnp.zeros((8, 128), jnp.float32)))
        _SINGLE_BUFFER_WEIGHTS = bool(jnp.all(out == 1.0))
    except Exception:
        _SINGLE_BUFFER_WEIGHTS = False
    return _SINGLE_BUFFER_WEIGHTS


# ---------------------------------------------------------------------------
# Fused EncoderLayer kernel.  grid = (batch, query-tile).
# ---------------------------------------------------------------------------
def _encoder_layer_kernel(
    xq_ref,    # (1, TQ, D) f32   query tile (also residual source)
    xkv_ref,   # (1, L,  D) bf16  full sequence (K/V path)
    wq_ref,    # (D, D)   bf16    W_Q
    wkv_ref,   # (D, 2D)  bf16    [W_K | W_V]
    wo_ref,    # (D, D)   bf16    W_out
    wf1_ref,   # (D, FF)  bf16
    wf2_ref,   # (FF, D)  bf16
    dvec_ref,  # (7, D)   f32     b_q, b_out, ln1_g, ln1_b, b_ff2, ln2_g, ln2_b
    bkv_ref,   # (1, 2D)  f32     [b_k | b_v]
    bf1_ref,   # (1, FF)  f32
    out_ref,   # (1, TQ, D)
    kv_ref,    # (L, 2D)  bf16    scratch: K/V activations for this batch row
    *, num_heads: int,
):
    H = num_heads
    xq = xq_ref[0]                         # (TQ, D) f32
    TQ, D = xq.shape
    dk = D // H
    scale = 1.0 / math.sqrt(dk)
    eps = 1e-5

    dv = dvec_ref[...]                     # (7, D) f32
    b_q, b_out = dv[0:1], dv[1:2]
    ln1_g, ln1_b = dv[2:3], dv[3:4]
    b_ff2 = dv[4:5]
    ln2_g, ln2_b = dv[5:6], dv[6:7]

    # ---- K / V projection: once per batch row.  The q-tile grid axis is
    # "arbitrary", so this scratch persists for the remaining query tiles.
    @pl.when(pl.program_id(1) == 0)
    def _():
        kv = jnp.dot(xkv_ref[0], wkv_ref[...],
                     preferred_element_type=jnp.float32) + bkv_ref[...]
        kv_ref[...] = kv.astype(jnp.bfloat16)

    # ---- Q projection for this tile (single full-width matmul).
    # Folding 1/sqrt(dk) into Q is equivalent to dividing the scores by
    # sqrt(dk) in the reference — do not "fix" it.
    q = jnp.dot(xq.astype(jnp.bfloat16), wq_ref[...],
                preferred_element_type=jnp.float32) + b_q
    q = (q * scale).astype(jnp.bfloat16)                       # (TQ, D)

    # ---- per-head scaled dot-product attention.  Only the score / context
    # matmuls (dk-sized dims, intrinsic to MHA) remain per head; the
    # slice/concat form avoids an unsupported (TQ,H,dk)->(H,TQ,dk) relayout.
    ctx_parts = []
    for h in range(H):
        qh = q[:, h * dk:(h + 1) * dk]                         # (TQ, dk) bf16
        kh = kv_ref[:, h * dk:(h + 1) * dk]                    # (L,  dk) bf16
        vh = kv_ref[:, D + h * dk:D + (h + 1) * dk]            # (L,  dk) bf16
        s = jax.lax.dot_general(qh, kh, (((1,), (1,)), ((), ())),
                                preferred_element_type=jnp.float32)  # (TQ, L)
        s = s - jnp.max(s, axis=-1, keepdims=True)
        p = jnp.exp(s)
        p = p / jnp.sum(p, axis=-1, keepdims=True)             # exact divide
        ctx_parts.append(
            jnp.dot(p.astype(jnp.bfloat16), vh,
                    preferred_element_type=jnp.float32).astype(jnp.bfloat16))
    ctx = jnp.concatenate(ctx_parts, axis=-1)                  # (TQ, D) bf16

    # ---- out projection: one full-width matmul over concat(heads).
    attn = jnp.dot(ctx, wo_ref[...],
                   preferred_element_type=jnp.float32) + b_out

    # ---- residual + LayerNorm 1 (dropout = identity in eval mode).
    x1 = xq + attn
    mu = jnp.mean(x1, axis=-1, keepdims=True)
    var = jnp.mean((x1 - mu) ** 2, axis=-1, keepdims=True)
    x1 = (x1 - mu) * jax.lax.rsqrt(var + eps) * ln1_g + ln1_b

    # ---- feed-forward.
    ff = jnp.dot(x1.astype(jnp.bfloat16), wf1_ref[...],
                 preferred_element_type=jnp.float32) + bf1_ref[...]
    ff = jnp.maximum(ff, 0.0)
    ff = jnp.dot(ff.astype(jnp.bfloat16), wf2_ref[...],
                 preferred_element_type=jnp.float32) + b_ff2

    # ---- residual + LayerNorm 2.
    x2 = x1 + ff
    mu2 = jnp.mean(x2, axis=-1, keepdims=True)
    var2 = jnp.mean((x2 - mu2) ** 2, axis=-1, keepdims=True)
    y = (x2 - mu2) * jax.lax.rsqrt(var2 + eps) * ln2_g + ln2_b
    out_ref[0] = y.astype(out_ref.dtype)


# ---------------------------------------------------------------------------
# Tiling / VMEM heuristics.
# ---------------------------------------------------------------------------
def _default_tq_max():
    # v6e's 256-wide MXU benefits from TQ=256; keep 128 on v5e (128-wide MXU)
    # and on v7x (64 MiB VMEM per TC).
    try:
        kind = jax.devices()[0].device_kind.lower()
    except Exception:
        return 128
    return 256 if "v6" in kind else 128


def _pick_tq(L, tq_max):
    if L <= tq_max:
        return L
    for t in (tq_max, 128, 64, 32, 16, 8):
        if t <= tq_max and L % t == 0:
            return t
    return min(L, tq_max)   # tail tile handled by Pallas edge-block padding


def _vmem_limit_bytes(L, D, FF, tq):
    f32, bf16 = 4, 2
    wbuf = 1 if _SINGLE_BUFFER_WEIGHTS else 2
    weights = (4 * D * D + 2 * D * FF) * bf16
    biases = (9 * D + FF) * f32
    blocks = 2 * (2 * tq * D * f32 + L * D * bf16) + wbuf * (weights + biases)
    scratch = 2 * L * D * bf16                                  # K/V activations
    interm = (8 * tq * D + 4 * tq * L + 2 * L * D) * f32 + tq * FF * (f32 + bf16)
    est = blocks + scratch + interm + (4 << 20)
    try:
        cap = int(getattr(pltpu.get_tpu_info(), "vmem_capacity_bytes", 128 << 20))
    except Exception:
        cap = 128 << 20
    hard_cap = max(min(96 << 20, cap - (8 << 20)), 16 << 20)    # ~56 MiB on v7x
    return int(min(max(est, 32 << 20), hard_cap))


# ---------------------------------------------------------------------------
# Wrapper: one fused encoder layer.
# ---------------------------------------------------------------------------
def encoder_layer(x, x_kv, prepped, num_heads, *, tq=None):
    B, L, D = x.shape
    H = num_heads
    assert D % H == 0
    FF = prepped["wf1"].shape[1]
    if tq is None:
        tq = _pick_tq(L, _default_tq_max())
    nq = pl.cdiv(L, tq)

    def _const_spec(shape):
        idx = lambda b, q: (0,) * len(shape)
        if _SINGLE_BUFFER_WEIGHTS:
            return pl.BlockSpec(shape, idx, pipeline_mode=pl.Buffered(1))
        return pl.BlockSpec(shape, idx)

    in_specs = [
        pl.BlockSpec((1, tq, D), lambda b, q: (b, q, 0)),   # query tile (f32)
        pl.BlockSpec((1, L, D), lambda b, q: (b, 0, 0)),    # full seq (bf16);
                                                            # index constant in q
                                                            # -> DMA once per row
        _const_spec((D, D)),        # W_Q
        _const_spec((D, 2 * D)),    # [W_K | W_V]
        _const_spec((D, D)),        # W_out
        _const_spec((D, FF)),       # FFN W1
        _const_spec((FF, D)),       # FFN W2
        _const_spec((7, D)),        # packed D-wide biases / LN params
        _const_spec((1, 2 * D)),    # [b_K | b_V]
        _const_spec((1, FF)),       # FFN b1
    ]
    out_specs = pl.BlockSpec((1, tq, D), lambda b, q: (b, q, 0))

    cost = pl.CostEstimate(
        flops=int(2 * B * L * D * (4 * D + 2 * FF + 2 * L)),
        transcendentals=int(B * H * L * L + 2 * B * L),
        bytes_accessed=int(B * L * D * 10 + (4 * D * D + 2 * D * FF) * 2
                           + (9 * D + FF) * 4),
    )

    kernel = functools.partial(_encoder_layer_kernel, num_heads=H)
    return pl.pallas_call(
        kernel,
        out_shape=jax.ShapeDtypeStruct((B, L, D), x.dtype),
        grid=(B, nq),
        in_specs=in_specs,
        out_specs=out_specs,
        scratch_shapes=[pltpu.VMEM((L, 2 * D), jnp.bfloat16)],
        compiler_params=pltpu.CompilerParams(
            # q-tile axis must be "arbitrary": the K/V scratch is reused
            # across it (batch axis stays megacore-parallel).
            dimension_semantics=("parallel", "arbitrary"),
            vmem_limit_bytes=_vmem_limit_bytes(L, D, FF, tq)),
        cost_estimate=cost,
    )(x, x_kv,
      prepped["wq"], prepped["wkv"], prepped["wo"],
      prepped["wf1"], prepped["wf2"], prepped["dvec"],
      prepped["bkv"], prepped["bf1"])


@functools.partial(jax.jit, static_argnames=("num_heads",))
def encoder_forward(x, prepped_layers, num_heads):
    for lp in prepped_layers:
        # K/V-path activation cast to bf16 once per layer (amortized, not per
        # grid step); query/residual path stays f32.
        x = encoder_layer(x, x.astype(jnp.bfloat16), lp, num_heads)
    return x


# ---------------------------------------------------------------------------
# Parameter packing: natural (PyTorch-like) params -> kernel format.
# ---------------------------------------------------------------------------
def prepare_layer_params(p, num_heads):
    D = p["wq"].shape[0]
    assert D % num_heads == 0
    wkv = jnp.concatenate([p["wk"], p["wv"]], axis=1)            # (D, 2D)
    bkv = jnp.concatenate([p["bk"], p["bv"]], axis=1)            # (1, 2D)
    dvec = jnp.stack([p["bq"][0], p["bo"][0], p["g1"][0], p["be1"][0],
                      p["bf2"][0], p["g2"][0], p["be2"][0]])     # (7, D)
    return dict(
        wq=p["wq"].astype(jnp.bfloat16),
        wkv=wkv.astype(jnp.bfloat16),
        wo=p["wo"].astype(jnp.bfloat16),
        wf1=p["wf1"].astype(jnp.bfloat16),
        wf2=p["wf2"].astype(jnp.bfloat16),
        dvec=dvec.astype(jnp.float32),
        bkv=bkv.astype(jnp.float32),
        bf1=p["bf1"].astype(jnp.float32),
    )


# ---------------------------------------------------------------------------
# Deterministic parameter init (PyTorch-Linear-style uniform bounds).
# ---------------------------------------------------------------------------
def init_params(key, d_model, ff_hidden, n_layers):
    def linear(k, fan_in, fan_out):
        bound = 1.0 / math.sqrt(fan_in)
        kw, kb = jax.random.split(k)
        w = jax.random.uniform(kw, (fan_in, fan_out), jnp.float32, -bound, bound)
        b = jax.random.uniform(kb, (1, fan_out), jnp.float32, -bound, bound)
        return w, b

    layers = []
    for li in range(n_layers):
        k = jax.random.fold_in(key, li)
        ks = jax.random.split(k, 6)
        wq, bq = linear(ks[0], d_model, d_model)
        wk, bk = linear(ks[1], d_model, d_model)
        wv, bv = linear(ks[2], d_model, d_model)
        wo, bo = linear(ks[3], d_model, d_model)
        wf1, bf1 = linear(ks[4], d_model, ff_hidden)
        wf2, bf2 = linear(ks[5], ff_hidden, d_model)
        layers.append(dict(
            wq=wq, bq=bq, wk=wk, bk=bk, wv=wv, bv=bv, wo=wo, bo=bo,
            g1=jnp.ones((1, d_model), jnp.float32),
            be1=jnp.zeros((1, d_model), jnp.float32),
            wf1=wf1, bf1=bf1, wf2=wf2, bf2=bf2,
            g2=jnp.ones((1, d_model), jnp.float32),
            be2=jnp.zeros((1, d_model), jnp.float32),
        ))
    return layers


# ---------------------------------------------------------------------------
# Pure-JAX f32 reference (mirrors the PyTorch forward, eval mode).
# ---------------------------------------------------------------------------
def reference_forward(x, all_params, num_heads):
    eps = 1e-5
    B, L, D = x.shape
    dk = D // num_heads
    for p in all_params:
        q = x @ p["wq"] + p["bq"][0]
        k = x @ p["wk"] + p["bk"][0]
        v = x @ p["wv"] + p["bv"][0]
        qh = q.reshape(B, L, num_heads, dk).transpose(0, 2, 1, 3)
        kh = k.reshape(B, L, num_heads, dk).transpose(0, 2, 1, 3)
        vh = v.reshape(B, L, num_heads, dk).transpose(0, 2, 1, 3)
        scores = jnp.einsum("bhld,bhsd->bhls", qh, kh) / math.sqrt(dk)
        w = jax.nn.softmax(scores, axis=-1)
        attn = jnp.einsum("bhls,bhsd->bhld", w, vh)
        attn = attn.transpose(0, 2, 1, 3).reshape(B, L, D)
        attn = attn @ p["wo"] + p["bo"][0]
        x1 = x + attn
        mu = x1.mean(-1, keepdims=True)
        var = ((x1 - mu) ** 2).mean(-1, keepdims=True)
        x1 = (x1 - mu) / jnp.sqrt(var + eps) * p["g1"][0] + p["be1"][0]
        ff = jnp.maximum(x1 @ p["wf1"] + p["bf1"][0], 0.0) @ p["wf2"] + p["bf2"][0]
        x2 = x1 + ff
        mu2 = x2.mean(-1, keepdims=True)
        var2 = ((x2 - mu2) ** 2).mean(-1, keepdims=True)
        x = (x2 - mu2) / jnp.sqrt(var2 + eps) * p["g2"][0] + p["be2"][0]
    return x


if __name__ == "__main__":
    # Small shapes consistent with the module: d_model % h == 0.
    B, L, D, H, FF, N = 2, 8, 32, 4, 64, 2

    # Enables single-buffered constant-index weight specs if supported.
    probe_single_buffer_support()

    key = jax.random.PRNGKey(0)
    kx, kp = jax.random.split(key)
    x = jax.random.normal(kx, (B, L, D), jnp.float32)
    params = init_params(kp, D, FF, N)
    prepped = [prepare_layer_params(p, H) for p in params]

    out = encoder_forward(x, prepped, num_heads=H)
    out = jax.block_until_ready(out)

    ref = reference_forward(x, params, H)
    assert out.shape == (B, L, D)
    max_err = float(jnp.max(jnp.abs(out - ref)))
    # bf16 matmul operands (f32 accumulation) => looser tolerance than f32;
    # typical max abs err is ~1e-2 at these shapes.
    assert jnp.allclose(out, ref, atol=5e-2, rtol=5e-2), (
        f"mismatch vs reference (max abs err {max_err})")

    print("KERNEL_OK")
</pallas_src>

<mosaic_0001>
module attributes {stable_mosaic.version = 11 : i64} {
  func.func @_k(%arg0: i32, %arg1: memref<8x128xf32, #tpu.memory_space<vmem>>, %arg2: memref<8x128xf32, #tpu.memory_space<vmem>>) attributes {dimension_semantics = [#tpu.dimension_semantics<arbitrary>], iteration_bounds = array<i64: 2>, scalar_prefetch = 0 : i64, scratch_operands = 0 : i64, tpu.core_type = #tpu.core_type<tc>, window_params = [{pipeline_mode = #tpu.pipeline_mode<synchronous>, transform_indices = @transform_0, window_bounds = array<i64: 8, 128>}, {pipeline_mode = #tpu.pipeline_mode<synchronous>, transform_indices = @transform_1, window_bounds = array<i64: 8, 128>}]} {
    %c0 = arith.constant 0 : index
    %c0_0 = arith.constant 0 : index
    %0 = vector.load %arg1[%c0, %c0_0] : memref<8x128xf32, #tpu.memory_space<vmem>>, vector<8x128xf32>
    %cst = arith.constant 1.000000e+00 : f32
    %1 = vector.broadcast %cst : f32 to vector<8x128xf32>
    %2 = arith.addf %0, %1 : vector<8x128xf32>
    %c0_1 = arith.constant 0 : index
    %c0_2 = arith.constant 0 : index
    %3 = vector.load %arg2[%c0_1, %c0_2] : memref<8x128xf32, #tpu.memory_space<vmem>>, vector<8x128xf32>
    tpu.vector_store %arg2[%c0_1, %c0_2], %2 {strides = array<i32>} : memref<8x128xf32, #tpu.memory_space<vmem>>, vector<8x128xf32>,
    return
  }
  func.func @transform_0(%arg0: i32) -> (i32, i32) {
    %c0_i32 = arith.constant 0 : i32
    %c0_i32_0 = arith.constant 0 : i32
    %c0_i32_1 = arith.constant 0 : i32
    return %c0_i32, %c0_i32_0 : i32, i32
  }
  func.func @transform_1(%arg0: i32) -> (i32, i32) {
    %c0_i32 = arith.constant 0 : i32
    %c0_i32_0 = arith.constant 0 : i32
    %c0_i32_1 = arith.constant 0 : i32
    return %c0_i32, %c0_i32_0 : i32, i32
  }
}

module attributes {stable_mosaic.version = 11 : i64} {
  func.func @_encoder_layer_kernel(%arg0: i32, %arg1: i32, %arg2: memref<1x8x32xf32, #tpu.memory_space<vmem>>, %arg3: memref<1x8x32xbf16, #tpu.memory_space<vmem>>, %arg4: memref<32x32xbf16, #tpu.memory_space<vmem>>, %arg5: memref<32x64xbf16, #tpu.memory_space<vmem>>, %arg6: memref<32x32xbf16, #tpu.memory_space<vmem>>, %arg7: memref<32x64xbf16, #tpu.memory_space<vmem>>, %arg8: memref<64x32xbf16, #tpu.memory_space<vmem>>, %arg9: memref<7x32xf32, #tpu.memory_space<vmem>>, %arg10: memref<1x64xf32, #tpu.memory_space<vmem>>, %arg11: memref<1x64xf32, #tpu.memory_space<vmem>>, %arg12: memref<1x8x32xf32, #tpu.memory_space<vmem>>, %arg13: memref<8x64xbf16, #tpu.memory_space<vmem>>) attributes {dimension_semantics = [#tpu.dimension_semantics<parallel>, #tpu.dimension_semantics<arbitrary>], iteration_bounds = array<i64: 2, 1>, scalar_prefetch = 0 : i64, scratch_operands = 1 : i64, tpu.core_type = #tpu.core_type<tc>, window_params = [{transform_indices = @transform_0, window_bounds = array<i64: 1, 8, 32>}, {transform_indices = @transform_1, window_bounds = array<i64: 1, 8, 32>}, {pipeline_mode = #tpu.pipeline_mode<synchronous>, transform_indices = @transform_2, window_bounds = array<i64: 32, 32>}, {pipeline_mode = #tpu.pipeline_mode<synchronous>, transform_indices = @transform_3, window_bounds = array<i64: 32, 64>}, {pipeline_mode = #tpu.pipeline_mode<synchronous>, transform_indices = @transform_4, window_bounds = array<i64: 32, 32>}, {pipeline_mode = #tpu.pipeline_mode<synchronous>, transform_indices = @transform_5, window_bounds = array<i64: 32, 64>}, {pipeline_mode = #tpu.pipeline_mode<synchronous>, transform_indices = @transform_6, window_bounds = array<i64: 64, 32>}, {pipeline_mode = #tpu.pipeline_mode<synchronous>, transform_indices = @transform_7, window_bounds = array<i64: 7, 32>}, {pipeline_mode = #tpu.pipeline_mode<synchronous>, transform_indices = @transform_8, window_bounds = array<i64: 1, 64>}, {pipeline_mode = #tpu.pipeline_mode<synchronous>, transform_indices = @transform_9, window_bounds = array<i64: 1, 64>}, {transform_indices = @transform_10, window_bounds = array<i64: 1, 8, 32>}]} {
    %c0 = arith.constant 0 : index
    %c0_0 = arith.constant 0 : index
    %c0_1 = arith.constant 0 : index
    %0 = vector.load %arg2[%c0, %c0_0, %c0_1] : memref<1x8x32xf32, #tpu.memory_space<vmem>>, vector<1x8x32xf32>
    %1 = vector.shape_cast %0 : vector<1x8x32xf32> to vector<8x32xf32>
    %c0_2 = arith.constant 0 : index
    %c0_3 = arith.constant 0 : index
    %2 = vector.load %arg9[%c0_2, %c0_3] : memref<7x32xf32, #tpu.memory_space<vmem>>, vector<7x32xf32>
    %3 = vector.extract_strided_slice %2 {offsets = [0, 0], sizes = [1, 32], strides = [1, 1]} : vector<7x32xf32> to vector<1x32xf32>
    %4 = vector.extract_strided_slice %2 {offsets = [1, 0], sizes = [1, 32], strides = [1, 1]} : vector<7x32xf32> to vector<1x32xf32>
    %5 = vector.extract_strided_slice %2 {offsets = [2, 0], sizes = [1, 32], strides = [1, 1]} : vector<7x32xf32> to vector<1x32xf32>
    %6 = vector.extract_strided_slice %2 {offsets = [3, 0], sizes = [1, 32], strides = [1, 1]} : vector<7x32xf32> to vector<1x32xf32>
    %7 = vector.extract_strided_slice %2 {offsets = [4, 0], sizes = [1, 32], strides = [1, 1]} : vector<7x32xf32> to vector<1x32xf32>
    %8 = vector.extract_strided_slice %2 {offsets = [5, 0], sizes = [1, 32], strides = [1, 1]} : vector<7x32xf32> to vector<1x32xf32>
    %9 = vector.extract_strided_slice %2 {offsets = [6, 0], sizes = [1, 32], strides = [1, 1]} : vector<7x32xf32> to vector<1x32xf32>
    %c0_i32 = arith.constant 0 : i32
    %10 = arith.cmpi eq, %arg1, %c0_i32 : i32
    %11 = arith.extui %10 : i1 to i32
    %c0_i32_4 = arith.constant 0 : i32
    %12 = arith.cmpi ne, %11, %c0_i32_4 : i32
    scf.if %12 {
      %c0_58 = arith.constant 0 : index
      %c0_59 = arith.constant 0 : index
      %c0_60 = arith.constant 0 : index
      %152 = vector.load %arg3[%c0_58, %c0_59, %c0_60] : memref<1x8x32xbf16, #tpu.memory_space<vmem>>, vector<1x8x32xbf16>
      %153 = vector.shape_cast %152 : vector<1x8x32xbf16> to vector<8x32xbf16>
      %c0_61 = arith.constant 0 : index
      %c0_62 = arith.constant 0 : index
      %154 = vector.load %arg5[%c0_61, %c0_62] : memref<32x64xbf16, #tpu.memory_space<vmem>>, vector<32x64xbf16>
      %cst_63 = arith.constant dense<0.000000e+00> : vector<8x64xf32>
      %155 = tpu.matmul %153, %154, %cst_63 {dimension_numbers = #tpu.dot_dimension_numbers<[1], [0], [0], [1], [0, 0, 1, 1], [], []>} : vector<8x32xbf16>, vector<32x64xbf16>, vector<8x64xf32> -> vector<8x64xf32>
      %c0_64 = arith.constant 0 : index
      %c0_65 = arith.constant 0 : index
      %156 = vector.load %arg10[%c0_64, %c0_65] : memref<1x64xf32, #tpu.memory_space<vmem>>, vector<1x64xf32>
      %157 = vector.broadcast %156 : vector<1x64xf32> to vector<8x64xf32>
      %158 = arith.addf %155, %157 : vector<8x64xf32>
      %159 = arith.truncf %158 : vector<8x64xf32> to vector<8x64xbf16>
      %c0_66 = arith.constant 0 : index
      %c0_67 = arith.constant 0 : index
      %160 = vector.load %arg13[%c0_66, %c0_67] : memref<8x64xbf16, #tpu.memory_space<vmem>>, vector<8x64xbf16>
      tpu.vector_store %arg13[%c0_66, %c0_67], %159 {strides = array<i32>} : memref<8x64xbf16, #tpu.memory_space<vmem>>, vector<8x64xbf16>,
    } else {
    }
    %13 = arith.truncf %1 : vector<8x32xf32> to vector<8x32xbf16>
    %c0_5 = arith.constant 0 : index
    %c0_6 = arith.constant 0 : index
    %14 = vector.load %arg4[%c0_5, %c0_6] : memref<32x32xbf16, #tpu.memory_space<vmem>>, vector<32x32xbf16>
    %cst = arith.constant dense<0.000000e+00> : vector<8x32xf32>
    %15 = tpu.matmul %13, %14, %cst {dimension_numbers = #tpu.dot_dimension_numbers<[1], [0], [0], [1], [0, 0, 1, 1], [], []>} : vector<8x32xbf16>, vector<32x32xbf16>, vector<8x32xf32> -> vector<8x32xf32>
    %16 = vector.broadcast %3 : vector<1x32xf32> to vector<8x32xf32>
    %17 = arith.addf %15, %16 : vector<8x32xf32>
    %cst_7 = arith.constant 0.353553385 : f32
    %18 = vector.broadcast %cst_7 : f32 to vector<8x32xf32>
    %19 = arith.mulf %17, %18 : vector<8x32xf32>
    %20 = arith.truncf %19 : vector<8x32xf32> to vector<8x32xbf16>
    %21 = vector.extract_strided_slice %20 {offsets = [0, 0], sizes = [8, 8], strides = [1, 1]} : vector<8x32xbf16> to vector<8x8xbf16>
    %c0_8 = arith.constant 0 : index
    %c0_9 = arith.constant 0 : index
    %22 = vector.load %arg13[%c0_8, %c0_9] : memref<8x64xbf16, #tpu.memory_space<vmem>>, vector<8x8xbf16>
    %c0_10 = arith.constant 0 : index
    %c32 = arith.constant 32 : index
    %23 = vector.load %arg13[%c0_10, %c32] : memref<8x64xbf16, #tpu.memory_space<vmem>>, vector<8x8xbf16>
    %cst_11 = arith.constant dense<0.000000e+00> : vector<8x8xf32>
    %24 = tpu.matmul %21, %22, %cst_11 {dimension_numbers = #tpu.dot_dimension_numbers<[1], [1], [0], [0], [0, 0, 1, 0], [], []>} : vector<8x8xbf16>, vector<8x8xbf16>, vector<8x8xf32> -> vector<8x8xf32>
    %cst_12 = arith.constant dense<0xFF800000> : vector<8xf32>
    %25 = vector.multi_reduction <maximumf>, %24, %cst_12 [1] : vector<8x8xf32> to vector<8xf32>
    %26 = vector.shape_cast %25 : vector<8xf32> to vector<8x1xf32>
    %27 = vector.broadcast %26 : vector<8x1xf32> to vector<8x8xf32>
    %28 = arith.subf %24, %27 : vector<8x8xf32>
    %29 = math.exp %28 : vector<8x8xf32>
    %cst_13 = arith.constant dense<0.000000e+00> : vector<8xf32>
    %30 = vector.multi_reduction <add>, %29, %cst_13 [1] : vector<8x8xf32> to vector<8xf32>
    %31 = vector.shape_cast %30 : vector<8xf32> to vector<8x1xf32>
    %32 = vector.broadcast %31 : vector<8x1xf32> to vector<8x8xf32>
    %33 = arith.divf %29, %32 : vector<8x8xf32>
    %34 = arith.truncf %33 : vector<8x8xf32> to vector<8x8xbf16>
    %cst_14 = arith.constant dense<0.000000e+00> : vector<8x8xf32>
    %35 = tpu.matmul %34, %23, %cst_14 {dimension_numbers = #tpu.dot_dimension_numbers<[1], [0], [0], [1], [0, 0, 1, 1], [], []>} : vector<8x8xbf16>, vector<8x8xbf16>, vector<8x8xf32> -> vector<8x8xf32>
    %36 = arith.truncf %35 : vector<8x8xf32> to vector<8x8xbf16>
    %37 = vector.extract_strided_slice %20 {offsets = [0, 8], sizes = [8, 8], strides = [1, 1]} : vector<8x32xbf16> to vector<8x8xbf16>
    %c0_15 = arith.constant 0 : index
    %c8 = arith.constant 8 : index
    %38 = vector.load %arg13[%c0_15, %c8] : memref<8x64xbf16, #tpu.memory_space<vmem>>, vector<8x8xbf16>
    %c0_16 = arith.constant 0 : index
    %c40 = arith.constant 40 : index
    %39 = vector.load %arg13[%c0_16, %c40] : memref<8x64xbf16, #tpu.memory_space<vmem>>, vector<8x8xbf16>
    %cst_17 = arith.constant dense<0.000000e+00> : vector<8x8xf32>
    %40 = tpu.matmul %37, %38, %cst_17 {dimension_numbers = #tpu.dot_dimension_numbers<[1], [1], [0], [0], [0, 0, 1, 0], [], []>} : vector<8x8xbf16>, vector<8x8xbf16>, vector<8x8xf32> -> vector<8x8xf32>
    %cst_18 = arith.constant dense<0xFF800000> : vector<8xf32>
    %41 = vector.multi_reduction <maximumf>, %40, %cst_18 [1] : vector<8x8xf32> to vector<8xf32>
    %42 = vector.shape_cast %41 : vector<8xf32> to vector<8x1xf32>
    %43 = vector.broadcast %42 : vector<8x1xf32> to vector<8x8xf32>
    %44 = arith.subf %40, %43 : vector<8x8xf32>
    %45 = math.exp %44 : vector<8x8xf32>
    %cst_19 = arith.constant dense<0.000000e+00> : vector<8xf32>
    %46 = vector.multi_reduction <add>, %45, %cst_19 [1] : vector<8x8xf32> to vector<8xf32>
    %47 = vector.shape_cast %46 : vector<8xf32> to vector<8x1xf32>
    %48 = vector.broadcast %47 : vector<8x1xf32> to vector<8x8xf32>
    %49 = arith.divf %45, %48 : vector<8x8xf32>
    %50 = arith.truncf %49 : vector<8x8xf32> to vector<8x8xbf16>
    %cst_20 = arith.constant dense<0.000000e+00> : vector<8x8xf32>
    %51 = tpu.matmul %50, %39, %cst_20 {dimension_numbers = #tpu.dot_dimension_numbers<[1], [0], [0], [1], [0, 0, 1, 1], [], []>} : vector<8x8xbf16>, vector<8x8xbf16>, vector<8x8xf32> -> vector<8x8xf32>
    %52 = arith.truncf %51 : vector<8x8xf32> to vector<8x8xbf16>
    %53 = vector.extract_strided_slice %20 {offsets = [0, 16], sizes = [8, 8], strides = [1, 1]} : vector<8x32xbf16> to vector<8x8xbf16>
    %c0_21 = arith.constant 0 : index
    %c16 = arith.constant 16 : index
    %54 = vector.load %arg13[%c0_21, %c16] : memref<8x64xbf16, #tpu.memory_space<vmem>>, vector<8x8xbf16>
    %c0_22 = arith.constant 0 : index
    %c48 = arith.constant 48 : index
    %55 = vector.load %arg13[%c0_22, %c48] : memref<8x64xbf16, #tpu.memory_space<vmem>>, vector<8x8xbf16>
    %cst_23 = arith.constant dense<0.000000e+00> : vector<8x8xf32>
    %56 = tpu.matmul %53, %54, %cst_23 {dimension_numbers = #tpu.dot_dimension_numbers<[1], [1], [0], [0], [0, 0, 1, 0], [], []>} : vector<8x8xbf16>, vector<8x8xbf16>, vector<8x8xf32> -> vector<8x8xf32>
    %cst_24 = arith.constant dense<0xFF800000> : vector<8xf32>
    %57 = vector.multi_reduction <maximumf>, %56, %cst_24 [1] : vector<8x8xf32> to vector<8xf32>
    %58 = vector.shape_cast %57 : vector<8xf32> to vector<8x1xf32>
    %59 = vector.broadcast %58 : vector<8x1xf32> to vector<8x8xf32>
    %60 = arith.subf %56, %59 : vector<8x8xf32>
    %61 = math.exp %60 : vector<8x8xf32>
    %cst_25 = arith.constant dense<0.000000e+00> : vector<8xf32>
    %62 = vector.multi_reduction <add>, %61, %cst_25 [1] : vector<8x8xf32> to vector<8xf32>
    %63 = vector.shape_cast %62 : vector<8xf32> to vector<8x1xf32>
    %64 = vector.broadcast %63 : vector<8x1xf32> to vector<8x8xf32>
    %65 = arith.divf %61, %64 : vector<8x8xf32>
    %66 = arith.truncf %65 : vector<8x8xf32> to vector<8x8xbf16>
    %cst_26 = arith.constant dense<0.000000e+00> : vector<8x8xf32>
    %67 = tpu.matmul %66, %55, %cst_26 {dimension_numbers = #tpu.dot_dimension_numbers<[1], [0], [0], [1], [0, 0, 1, 1], [], []>} : vector<8x8xbf16>, vector<8x8xbf16>, vector<8x8xf32> -> vector<8x8xf32>
    %68 = arith.truncf %67 : vector<8x8xf32> to vector<8x8xbf16>
    %69 = vector.extract_strided_slice %20 {offsets = [0, 24], sizes = [8, 8], strides = [1, 1]} : vector<8x32xbf16> to vector<8x8xbf16>
    %c0_27 = arith.constant 0 : index
    %c24 = arith.constant 24 : index
    %70 = vector.load %arg13[%c0_27, %c24] : memref<8x64xbf16, #tpu.memory_space<vmem>>, vector<8x8xbf16>
    %c0_28 = arith.constant 0 : index
    %c56 = arith.constant 56 : index
    %71 = vector.load %arg13[%c0_28, %c56] : memref<8x64xbf16, #tpu.memory_space<vmem>>, vector<8x8xbf16>
    %cst_29 = arith.constant dense<0.000000e+00> : vector<8x8xf32>
    %72 = tpu.matmul %69, %70, %cst_29 {dimension_numbers = #tpu.dot_dimension_numbers<[1], [1], [0], [0], [0, 0, 1, 0], [], []>} : vector<8x8xbf16>, vector<8x8xbf16>, vector<8x8xf32> -> vector<8x8xf32>
    %cst_30 = arith.constant dense<0xFF800000> : vector<8xf32>
    %73 = vector.multi_reduction <maximumf>, %72, %cst_30 [1] : vector<8x8xf32> to vector<8xf32>
    %74 = vector.shape_cast %73 : vector<8xf32> to vector<8x1xf32>
    %75 = vector.broadcast %74 : vector<8x1xf32> to vector<8x8xf32>
    %76 = arith.subf %72, %75 : vector<8x8xf32>
    %77 = math.exp %76 : vector<8x8xf32>
    %cst_31 = arith.constant dense<0.000000e+00> : vector<8xf32>
    %78 = vector.multi_reduction <add>, %77, %cst_31 [1] : vector<8x8xf32> to vector<8xf32>
    %79 = vector.shape_cast %78 : vector<8xf32> to vector<8x1xf32>
    %80 = vector.broadcast %79 : vector<8x1xf32> to vector<8x8xf32>
    %81 = arith.divf %77, %80 : vector<8x8xf32>
    %82 = arith.truncf %81 : vector<8x8xf32> to vector<8x8xbf16>
    %cst_32 = arith.constant dense<0.000000e+00> : vector<8x8xf32>
    %83 = tpu.matmul %82, %71, %cst_32 {dimension_numbers = #tpu.dot_dimension_numbers<[1], [0], [0], [1], [0, 0, 1, 1], [], []>} : vector<8x8xbf16>, vector<8x8xbf16>, vector<8x8xf32> -> vector<8x8xf32>
    %84 = arith.truncf %83 : vector<8x8xf32> to vector<8x8xbf16>
    %85 = tpu.concatenate %36, %52, %68, %84 in 1 : vector<8x8xbf16>, vector<8x8xbf16>, vector<8x8xbf16>, vector<8x8xbf16> -> vector<8x32xbf16>
    %c0_33 = arith.constant 0 : index
    %c0_34 = arith.constant 0 : index
    %86 = vector.load %arg6[%c0_33, %c0_34] : memref<32x32xbf16, #tpu.memory_space<vmem>>, vector<32x32xbf16>
    %cst_35 = arith.constant dense<0.000000e+00> : vector<8x32xf32>
    %87 = tpu.matmul %85, %86, %cst_35 {dimension_numbers = #tpu.dot_dimension_numbers<[1], [0], [0], [1], [0, 0, 1, 1], [], []>} : vector<8x32xbf16>, vector<32x32xbf16>, vector<8x32xf32> -> vector<8x32xf32>
    %88 = vector.broadcast %4 : vector<1x32xf32> to vector<8x32xf32>
    %89 = arith.addf %87, %88 : vector<8x32xf32>
    %90 = arith.addf %1, %89 : vector<8x32xf32>
    %cst_36 = arith.constant dense<0.000000e+00> : vector<8xf32>
    %91 = vector.multi_reduction <add>, %90, %cst_36 [1] : vector<8x32xf32> to vector<8xf32>
    %92 = vector.shape_cast %91 : vector<8xf32> to vector<8x1xf32>
    %cst_37 = arith.constant 3.200000e+01 : f32
    %93 = vector.broadcast %cst_37 : f32 to vector<8x1xf32>
    %94 = arith.divf %92, %93 : vector<8x1xf32>
    %95 = vector.broadcast %94 : vector<8x1xf32> to vector<8x32xf32>
    %96 = arith.subf %90, %95 : vector<8x32xf32>
    %97 = arith.mulf %96, %96 : vector<8x32xf32>
    %cst_38 = arith.constant dense<0.000000e+00> : vector<8xf32>
    %98 = vector.multi_reduction <add>, %97, %cst_38 [1] : vector<8x32xf32> to vector<8xf32>
    %99 = vector.shape_cast %98 : vector<8xf32> to vector<8x1xf32>
    %cst_39 = arith.constant 3.200000e+01 : f32
    %100 = vector.broadcast %cst_39 : f32 to vector<8x1xf32>
    %101 = arith.divf %99, %100 : vector<8x1xf32>
    %102 = vector.broadcast %94 : vector<8x1xf32> to vector<8x32xf32>
    %103 = arith.subf %90, %102 : vector<8x32xf32>
    %cst_40 = arith.constant 9.99999974E-6 : f32
    %104 = vector.broadcast %cst_40 : f32 to vector<8x1xf32>
    %105 = arith.addf %101, %104 : vector<8x1xf32>
    %106 = math.rsqrt %105 : vector<8x1xf32>
    %107 = vector.broadcast %106 : vector<8x1xf32> to vector<8x32xf32>
    %108 = arith.mulf %103, %107 : vector<8x32xf32>
    %109 = vector.broadcast %5 : vector<1x32xf32> to vector<8x32xf32>
    %110 = arith.mulf %108, %109 : vector<8x32xf32>
    %111 = vector.broadcast %6 : vector<1x32xf32> to vector<8x32xf32>
    %112 = arith.addf %110, %111 : vector<8x32xf32>
    %113 = arith.truncf %112 : vector<8x32xf32> to vector<8x32xbf16>
    %c0_41 = arith.constant 0 : index
    %c0_42 = arith.constant 0 : index
    %114 = vector.load %arg7[%c0_41, %c0_42] : memref<32x64xbf16, #tpu.memory_space<vmem>>, vector<32x64xbf16>
    %cst_43 = arith.constant dense<0.000000e+00> : vector<8x64xf32>
    %115 = tpu.matmul %113, %114, %cst_43 {dimension_numbers = #tpu.dot_dimension_numbers<[1], [0], [0], [1], [0, 0, 1, 1], [], []>} : vector<8x32xbf16>, vector<32x64xbf16>, vector<8x64xf32> -> vector<8x64xf32>
    %c0_44 = arith.constant 0 : index
    %c0_45 = arith.constant 0 : index
    %116 = vector.load %arg11[%c0_44, %c0_45] : memref<1x64xf32, #tpu.memory_space<vmem>>, vector<1x64xf32>
    %117 = vector.broadcast %116 : vector<1x64xf32> to vector<8x64xf32>
    %118 = arith.addf %115, %117 : vector<8x64xf32>
    %cst_46 = arith.constant 0.000000e+00 : f32
    %119 = vector.broadcast %cst_46 : f32 to vector<8x64xf32>
    %120 = arith.maximumf %118, %119 : vector<8x64xf32>
    %121 = arith.truncf %120 : vector<8x64xf32> to vector<8x64xbf16>
    %c0_47 = arith.constant 0 : index
    %c0_48 = arith.constant 0 : index
    %122 = vector.load %arg8[%c0_47, %c0_48] : memref<64x32xbf16, #tpu.memory_space<vmem>>, vector<64x32xbf16>
    %cst_49 = arith.constant dense<0.000000e+00> : vector<8x32xf32>
    %123 = tpu.matmul %121, %122, %cst_49 {dimension_numbers = #tpu.dot_dimension_numbers<[1], [0], [0], [1], [0, 0, 1, 1], [], []>} : vector<8x64xbf16>, vector<64x32xbf16>, vector<8x32xf32> -> vector<8x32xf32>
    %124 = vector.broadcast %7 : vector<1x32xf32> to vector<8x32xf32>
    %125 = arith.addf %123, %124 : vector<8x32xf32>
    %126 = arith.addf %112, %125 : vector<8x32xf32>
    %cst_50 = arith.constant dense<0.000000e+00> : vector<8xf32>
    %127 = vector.multi_reduction <add>, %126, %cst_50 [1] : vector<8x32xf32> to vector<8xf32>
    %128 = vector.shape_cast %127 : vector<8xf32> to vector<8x1xf32>
    %cst_51 = arith.constant 3.200000e+01 : f32
    %129 = vector.broadcast %cst_51 : f32 to vector<8x1xf32>
    %130 = arith.divf %128, %129 : vector<8x1xf32>
    %131 = vector.broadcast %130 : vector<8x1xf32> to vector<8x32xf32>
    %132 = arith.subf %126, %131 : vector<8x32xf32>
    %133 = arith.mulf %132, %132 : vector<8x32xf32>
    %cst_52 = arith.constant dense<0.000000e+00> : vector<8xf32>
    %134 = vector.multi_reduction <add>, %133, %cst_52 [1] : vector<8x32xf32> to vector<8xf32>
    %135 = vector.shape_cast %134 : vector<8xf32> to vector<8x1xf32>
    %cst_53 = arith.constant 3.200000e+01 : f32
    %136 = vector.broadcast %cst_53 : f32 to vector<8x1xf32>
    %137 = arith.divf %135, %136 : vector<8x1xf32>
    %138 = vector.broadcast %130 : vector<8x1xf32> to vector<8x32xf32>
    %139 = arith.subf %126, %138 : vector<8x32xf32>
    %cst_54 = arith.constant 9.99999974E-6 : f32
    %140 = vector.broadcast %cst_54 : f32 to vector<8x1xf32>
    %141 = arith.addf %137, %140 : vector<8x1xf32>
    %142 = math.rsqrt %141 : vector<8x1xf32>
    %143 = vector.broadcast %142 : vector<8x1xf32> to vector<8x32xf32>
    %144 = arith.mulf %139, %143 : vector<8x32xf32>
    %145 = vector.broadcast %8 : vector<1x32xf32> to vector<8x32xf32>
    %146 = arith.mulf %144, %145 : vector<8x32xf32>
    %147 = vector.broadcast %9 : vector<1x32xf32> to vector<8x32xf32>
    %148 = arith.addf %146, %147 : vector<8x32xf32>
    %c0_55 = arith.constant 0 : index
    %c0_56 = arith.constant 0 : index
    %c0_57 = arith.constant 0 : index
    %149 = vector.load %arg12[%c0_55, %c0_56, %c0_57] : memref<1x8x32xf32, #tpu.memory_space<vmem>>, vector<1x8x32xf32>
    %150 = vector.shape_cast %149 : vector<1x8x32xf32> to vector<8x32xf32>
    %151 = vector.shape_cast %148 : vector<8x32xf32> to vector<1x8x32xf32>
    tpu.vector_store %arg12[%c0_55, %c0_56, %c0_57], %151 {strides = array<i32>} : memref<1x8x32xf32, #tpu.memory_space<vmem>>, vector<1x8x32xf32>,
    return
  }
  func.func @transform_0(%arg0: i32, %arg1: i32) -> (i32, i32, i32) {
    %c0_i32 = arith.constant 0 : i32
    %c0_i32_0 = arith.constant 0 : i32
    return %arg0, %arg1, %c0_i32 : i32, i32, i32
  }
  func.func @transform_1(%arg0: i32, %arg1: i32) -> (i32, i32, i32) {
    %c0_i32 = arith.constant 0 : i32
    %c0_i32_0 = arith.constant 0 : i32
    %c0_i32_1 = arith.constant 0 : i32
    return %arg0, %c0_i32, %c0_i32_0 : i32, i32, i32
  }
  func.func @transform_2(%arg0: i32, %arg1: i32) -> (i32, i32) {
    %c0_i32 = arith.constant 0 : i32
    %c0_i32_0 = arith.constant 0 : i32
    %c0_i32_1 = arith.constant 0 : i32
    return %c0_i32, %c0_i32_0 : i32, i32
  }
  func.func @transform_3(%arg0: i32, %arg1: i32) -> (i32, i32) {
    %c0_i32 = arith.constant 0 : i32
    %c0_i32_0 = arith.constant 0 : i32
    %c0_i32_1 = arith.constant 0 : i32
    return %c0_i32, %c0_i32_0 : i32, i32
  }
  func.func @transform_4(%arg0: i32, %arg1: i32) -> (i32, i32) {
    %c0_i32 = arith.constant 0 : i32
    %c0_i32_0 = arith.constant 0 : i32
    %c0_i32_1 = arith.constant 0 : i32
    return %c0_i32, %c0_i32_0 : i32, i32
  }
  func.func @transform_5(%arg0: i32, %arg1: i32) -> (i32, i32) {
    %c0_i32 = arith.constant 0 : i32
    %c0_i32_0 = arith.constant 0 : i32
    %c0_i32_1 = arith.constant 0 : i32
    return %c0_i32, %c0_i32_0 : i32, i32
  }
  func.func @transform_6(%arg0: i32, %arg1: i32) -> (i32, i32) {
    %c0_i32 = arith.constant 0 : i32
    %c0_i32_0 = arith.constant 0 : i32
    %c0_i32_1 = arith.constant 0 : i32
    return %c0_i32, %c0_i32_0 : i32, i32
  }
  func.func @transform_7(%arg0: i32, %arg1: i32) -> (i32, i32) {
    %c0_i32 = arith.constant 0 : i32
    %c0_i32_0 = arith.constant 0 : i32
    %c0_i32_1 = arith.constant 0 : i32
    return %c0_i32, %c0_i32_0 : i32, i32
  }
  func.func @transform_8(%arg0: i32, %arg1: i32) -> (i32, i32) {
    %c0_i32 = arith.constant 0 : i32
    %c0_i32_0 = arith.constant 0 : i32
    %c0_i32_1 = arith.constant 0 : i32
    return %c0_i32, %c0_i32_0 : i32, i32
  }
  func.func @transform_9(%arg0: i32, %arg1: i32) -> (i32, i32) {
    %c0_i32 = arith.constant 0 : i32
    %c0_i32_0 = arith.constant 0 : i32
    %c0_i32_1 = arith.constant 0 : i32
    return %c0_i32, %c0_i32_0 : i32, i32
  }
  func.func @transform_10(%arg0: i32, %arg1: i32) -> (i32, i32, i32) {
    %c0_i32 = arith.constant 0 : i32
    %c0_i32_0 = arith.constant 0 : i32
    return %arg0, %arg1, %c0_i32 : i32, i32, i32
  }
}

module attributes {stable_mosaic.version = 11 : i64} {
  func.func @_encoder_layer_kernel(%arg0: i32, %arg1: i32, %arg2: memref<1x8x32xf32, #tpu.memory_space<vmem>>, %arg3: memref<1x8x32xbf16, #tpu.memory_space<vmem>>, %arg4: memref<32x32xbf16, #tpu.memory_space<vmem>>, %arg5: memref<32x64xbf16, #tpu.memory_space<vmem>>, %arg6: memref<32x32xbf16, #tpu.memory_space<vmem>>, %arg7: memref<32x64xbf16, #tpu.memory_space<vmem>>, %arg8: memref<64x32xbf16, #tpu.memory_space<vmem>>, %arg9: memref<7x32xf32, #tpu.memory_space<vmem>>, %arg10: memref<1x64xf32, #tpu.memory_space<vmem>>, %arg11: memref<1x64xf32, #tpu.memory_space<vmem>>, %arg12: memref<1x8x32xf32, #tpu.memory_space<vmem>>, %arg13: memref<8x64xbf16, #tpu.memory_space<vmem>>) attributes {dimension_semantics = [#tpu.dimension_semantics<parallel>, #tpu.dimension_semantics<arbitrary>], iteration_bounds = array<i64: 2, 1>, scalar_prefetch = 0 : i64, scratch_operands = 1 : i64, tpu.core_type = #tpu.core_type<tc>, window_params = [{transform_indices = @transform_0, window_bounds = array<i64: 1, 8, 32>}, {transform_indices = @transform_1, window_bounds = array<i64: 1, 8, 32>}, {pipeline_mode = #tpu.pipeline_mode<synchronous>, transform_indices = @transform_2, window_bounds = array<i64: 32, 32>}, {pipeline_mode = #tpu.pipeline_mode<synchronous>, transform_indices = @transform_3, window_bounds = array<i64: 32, 64>}, {pipeline_mode = #tpu.pipeline_mode<synchronous>, transform_indices = @transform_4, window_bounds = array<i64: 32, 32>}, {pipeline_mode = #tpu.pipeline_mode<synchronous>, transform_indices = @transform_5, window_bounds = array<i64: 32, 64>}, {pipeline_mode = #tpu.pipeline_mode<synchronous>, transform_indices = @transform_6, window_bounds = array<i64: 64, 32>}, {pipeline_mode = #tpu.pipeline_mode<synchronous>, transform_indices = @transform_7, window_bounds = array<i64: 7, 32>}, {pipeline_mode = #tpu.pipeline_mode<synchronous>, transform_indices = @transform_8, window_bounds = array<i64: 1, 64>}, {pipeline_mode = #tpu.pipeline_mode<synchronous>, transform_indices = @transform_9, window_bounds = array<i64: 1, 64>}, {transform_indices = @transform_10, window_bounds = array<i64: 1, 8, 32>}]} {
    %c0 = arith.constant 0 : index
    %c0_0 = arith.constant 0 : index
    %c0_1 = arith.constant 0 : index
    %0 = vector.load %arg2[%c0, %c0_0, %c0_1] : memref<1x8x32xf32, #tpu.memory_space<vmem>>, vector<1x8x32xf32>
    %1 = vector.shape_cast %0 : vector<1x8x32xf32> to vector<8x32xf32>
    %c0_2 = arith.constant 0 : index
    %c0_3 = arith.constant 0 : index
    %2 = vector.load %arg9[%c0_2, %c0_3] : memref<7x32xf32, #tpu.memory_space<vmem>>, vector<7x32xf32>
    %3 = vector.extract_strided_slice %2 {offsets = [0, 0], sizes = [1, 32], strides = [1, 1]} : vector<7x32xf32> to vector<1x32xf32>
    %4 = vector.extract_strided_slice %2 {offsets = [1, 0], sizes = [1, 32], strides = [1, 1]} : vector<7x32xf32> to vector<1x32xf32>
    %5 = vector.extract_strided_slice %2 {offsets = [2, 0], sizes = [1, 32], strides = [1, 1]} : vector<7x32xf32> to vector<1x32xf32>
    %6 = vector.extract_strided_slice %2 {offsets = [3, 0], sizes = [1, 32], strides = [1, 1]} : vector<7x32xf32> to vector<1x32xf32>
    %7 = vector.extract_strided_slice %2 {offsets = [4, 0], sizes = [1, 32], strides = [1, 1]} : vector<7x32xf32> to vector<1x32xf32>
    %8 = vector.extract_strided_slice %2 {offsets = [5, 0], sizes = [1, 32], strides = [1, 1]} : vector<7x32xf32> to vector<1x32xf32>
    %9 = vector.extract_strided_slice %2 {offsets = [6, 0], sizes = [1, 32], strides = [1, 1]} : vector<7x32xf32> to vector<1x32xf32>
    %c0_i32 = arith.constant 0 : i32
    %10 = arith.cmpi eq, %arg1, %c0_i32 : i32
    %11 = arith.extui %10 : i1 to i32
    %c0_i32_4 = arith.constant 0 : i32
    %12 = arith.cmpi ne, %11, %c0_i32_4 : i32
    scf.if %12 {
      %c0_58 = arith.constant 0 : index
      %c0_59 = arith.constant 0 : index
      %c0_60 = arith.constant 0 : index
      %152 = vector.load %arg3[%c0_58, %c0_59, %c0_60] : memref<1x8x32xbf16, #tpu.memory_space<vmem>>, vector<1x8x32xbf16>
      %153 = vector.shape_cast %152 : vector<1x8x32xbf16> to vector<8x32xbf16>
      %c0_61 = arith.constant 0 : index
      %c0_62 = arith.constant 0 : index
      %154 = vector.load %arg5[%c0_61, %c0_62] : memref<32x64xbf16, #tpu.memory_space<vmem>>, vector<32x64xbf16>
      %cst_63 = arith.constant dense<0.000000e+00> : vector<8x64xf32>
      %155 = tpu.matmul %153, %154, %cst_63 {dimension_numbers = #tpu.dot_dimension_numbers<[1], [0], [0], [1], [0, 0, 1, 1], [], []>} : vector<8x32xbf16>, vector<32x64xbf16>, vector<8x64xf32> -> vector<8x64xf32>
      %c0_64 = arith.constant 0 : index
      %c0_65 = arith.constant 0 : index
      %156 = vector.load %arg10[%c0_64, %c0_65] : memref<1x64xf32, #tpu.memory_space<vmem>>, vector<1x64xf32>
      %157 = vector.broadcast %156 : vector<1x64xf32> to vector<8x64xf32>
      %158 = arith.addf %155, %157 : vector<8x64xf32>
      %159 = arith.truncf %158 : vector<8x64xf32> to vector<8x64xbf16>
      %c0_66 = arith.constant 0 : index
      %c0_67 = arith.constant 0 : index
      %160 = vector.load %arg13[%c0_66, %c0_67] : memref<8x64xbf16, #tpu.memory_space<vmem>>, vector<8x64xbf16>
      tpu.vector_store %arg13[%c0_66, %c0_67], %159 {strides = array<i32>} : memref<8x64xbf16, #tpu.memory_space<vmem>>, vector<8x64xbf16>,
    } else {
    }
    %13 = arith.truncf %1 : vector<8x32xf32> to vector<8x32xbf16>
    %c0_5 = arith.constant 0 : index
    %c0_6 = arith.constant 0 : index
    %14 = vector.load %arg4[%c0_5, %c0_6] : memref<32x32xbf16, #tpu.memory_space<vmem>>, vector<32x32xbf16>
    %cst = arith.constant dense<0.000000e+00> : vector<8x32xf32>
    %15 = tpu.matmul %13, %14, %cst {dimension_numbers = #tpu.dot_dimension_numbers<[1], [0], [0], [1], [0, 0, 1, 1], [], []>} : vector<8x32xbf16>, vector<32x32xbf16>, vector<8x32xf32> -> vector<8x32xf32>
    %16 = vector.broadcast %3 : vector<1x32xf32> to vector<8x32xf32>
    %17 = arith.addf %15, %16 : vector<8x32xf32>
    %cst_7 = arith.constant 0.353553385 : f32
    %18 = vector.broadcast %cst_7 : f32 to vector<8x32xf32>
    %19 = arith.mulf %17, %18 : vector<8x32xf32>
    %20 = arith.truncf %19 : vector<8x32xf32> to vector<8x32xbf16>
    %21 = vector.extract_strided_slice %20 {offsets = [0, 0], sizes = [8, 8], strides = [1, 1]} : vector<8x32xbf16> to vector<8x8xbf16>
    %c0_8 = arith.constant 0 : index
    %c0_9 = arith.constant 0 : index
    %22 = vector.load %arg13[%c0_8, %c0_9] : memref<8x64xbf16, #tpu.memory_space<vmem>>, vector<8x8xbf16>
    %c0_10 = arith.constant 0 : index
    %c32 = arith.constant 32 : index
    %23 = vector.load %arg13[%c0_10, %c32] : memref<8x64xbf16, #tpu.memory_space<vmem>>, vector<8x8xbf16>
    %cst_11 = arith.constant dense<0.000000e+00> : vector<8x8xf32>
    %24 = tpu.matmul %21, %22, %cst_11 {dimension_numbers = #tpu.dot_dimension_numbers<[1], [1], [0], [0], [0, 0, 1, 0], [], []>} : vector<8x8xbf16>, vector<8x8xbf16>, vector<8x8xf32> -> vector<8x8xf32>
    %cst_12 = arith.constant dense<0xFF800000> : vector<8xf32>
    %25 = vector.multi_reduction <maximumf>, %24, %cst_12 [1] : vector<8x8xf32> to vector<8xf32>
    %26 = vector.shape_cast %25 : vector<8xf32> to vector<8x1xf32>
    %27 = vector.broadcast %26 : vector<8x1xf32> to vector<8x8xf32>
    %28 = arith.subf %24, %27 : vector<8x8xf32>
    %29 = math.exp %28 : vector<8x8xf32>
    %cst_13 = arith.constant dense<0.000000e+00> : vector<8xf32>
    %30 = vector.multi_reduction <add>, %29, %cst_13 [1] : vector<8x8xf32> to vector<8xf32>
    %31 = vector.shape_cast %30 : vector<8xf32> to vector<8x1xf32>
    %32 = vector.broadcast %31 : vector<8x1xf32> to vector<8x8xf32>
    %33 = arith.divf %29, %32 : vector<8x8xf32>
    %34 = arith.truncf %33 : vector<8x8xf32> to vector<8x8xbf16>
    %cst_14 = arith.constant dense<0.000000e+00> : vector<8x8xf32>
    %35 = tpu.matmul %34, %23, %cst_14 {dimension_numbers = #tpu.dot_dimension_numbers<[1], [0], [0], [1], [0, 0, 1, 1], [], []>} : vector<8x8xbf16>, vector<8x8xbf16>, vector<8x8xf32> -> vector<8x8xf32>
    %36 = arith.truncf %35 : vector<8x8xf32> to vector<8x8xbf16>
    %37 = vector.extract_strided_slice %20 {offsets = [0, 8], sizes = [8, 8], strides = [1, 1]} : vector<8x32xbf16> to vector<8x8xbf16>
    %c0_15 = arith.constant 0 : index
    %c8 = arith.constant 8 : index
    %38 = vector.load %arg13[%c0_15, %c8] : memref<8x64xbf16, #tpu.memory_space<vmem>>, vector<8x8xbf16>
    %c0_16 = arith.constant 0 : index
    %c40 = arith.constant 40 : index
    %39 = vector.load %arg13[%c0_16, %c40] : memref<8x64xbf16, #tpu.memory_space<vmem>>, vector<8x8xbf16>
    %cst_17 = arith.constant dense<0.000000e+00> : vector<8x8xf32>
    %40 = tpu.matmul %37, %38, %cst_17 {dimension_numbers = #tpu.dot_dimension_numbers<[1], [1], [0], [0], [0, 0, 1, 0], [], []>} : vector<8x8xbf16>, vector<8x8xbf16>, vector<8x8xf32> -> vector<8x8xf32>
    %cst_18 = arith.constant dense<0xFF800000> : vector<8xf32>
    %41 = vector.multi_reduction <maximumf>, %40, %cst_18 [1] : vector<8x8xf32> to vector<8xf32>
    %42 = vector.shape_cast %41 : vector<8xf32> to vector<8x1xf32>
    %43 = vector.broadcast %42 : vector<8x1xf32> to vector<8x8xf32>
    %44 = arith.subf %40, %43 : vector<8x8xf32>
    %45 = math.exp %44 : vector<8x8xf32>
    %cst_19 = arith.constant dense<0.000000e+00> : vector<8xf32>
    %46 = vector.multi_reduction <add>, %45, %cst_19 [1] : vector<8x8xf32> to vector<8xf32>
    %47 = vector.shape_cast %46 : vector<8xf32> to vector<8x1xf32>
    %48 = vector.broadcast %47 : vector<8x1xf32> to vector<8x8xf32>
    %49 = arith.divf %45, %48 : vector<8x8xf32>
    %50 = arith.truncf %49 : vector<8x8xf32> to vector<8x8xbf16>
    %cst_20 = arith.constant dense<0.000000e+00> : vector<8x8xf32>
    %51 = tpu.matmul %50, %39, %cst_20 {dimension_numbers = #tpu.dot_dimension_numbers<[1], [0], [0], [1], [0, 0, 1, 1], [], []>} : vector<8x8xbf16>, vector<8x8xbf16>, vector<8x8xf32> -> vector<8x8xf32>
    %52 = arith.truncf %51 : vector<8x8xf32> to vector<8x8xbf16>
    %53 = vector.extract_strided_slice %20 {offsets = [0, 16], sizes = [8, 8], strides = [1, 1]} : vector<8x32xbf16> to vector<8x8xbf16>
    %c0_21 = arith.constant 0 : index
    %c16 = arith.constant 16 : index
    %54 = vector.load %arg13[%c0_21, %c16] : memref<8x64xbf16, #tpu.memory_space<vmem>>, vector<8x8xbf16>
    %c0_22 = arith.constant 0 : index
    %c48 = arith.constant 48 : index
    %55 = vector.load %arg13[%c0_22, %c48] : memref<8x64xbf16, #tpu.memory_space<vmem>>, vector<8x8xbf16>
    %cst_23 = arith.constant dense<0.000000e+00> : vector<8x8xf32>
    %56 = tpu.matmul %53, %54, %cst_23 {dimension_numbers = #tpu.dot_dimension_numbers<[1], [1], [0], [0], [0, 0, 1, 0], [], []>} : vector<8x8xbf16>, vector<8x8xbf16>, vector<8x8xf32> -> vector<8x8xf32>
    %cst_24 = arith.constant dense<0xFF800000> : vector<8xf32>
    %57 = vector.multi_reduction <maximumf>, %56, %cst_24 [1] : vector<8x8xf32> to vector<8xf32>
    %58 = vector.shape_cast %57 : vector<8xf32> to vector<8x1xf32>
    %59 = vector.broadcast %58 : vector<8x1xf32> to vector<8x8xf32>
    %60 = arith.subf %56, %59 : vector<8x8xf32>
    %61 = math.exp %60 : vector<8x8xf32>
    %cst_25 = arith.constant dense<0.000000e+00> : vector<8xf32>
    %62 = vector.multi_reduction <add>, %61, %cst_25 [1] : vector<8x8xf32> to vector<8xf32>
    %63 = vector.shape_cast %62 : vector<8xf32> to vector<8x1xf32>
    %64 = vector.broadcast %63 : vector<8x1xf32> to vector<8x8xf32>
    %65 = arith.divf %61, %64 : vector<8x8xf32>
    %66 = arith.truncf %65 : vector<8x8xf32> to vector<8x8xbf16>
    %cst_26 = arith.constant dense<0.000000e+00> : vector<8x8xf32>
    %67 = tpu.matmul %66, %55, %cst_26 {dimension_numbers = #tpu.dot_dimension_numbers<[1], [0], [0], [1], [0, 0, 1, 1], [], []>} : vector<8x8xbf16>, vector<8x8xbf16>, vector<8x8xf32> -> vector<8x8xf32>
    %68 = arith.truncf %67 : vector<8x8xf32> to vector<8x8xbf16>
    %69 = vector.extract_strided_slice %20 {offsets = [0, 24], sizes = [8, 8], strides = [1, 1]} : vector<8x32xbf16> to vector<8x8xbf16>
    %c0_27 = arith.constant 0 : index
    %c24 = arith.constant 24 : index
    %70 = vector.load %arg13[%c0_27, %c24] : memref<8x64xbf16, #tpu.memory_space<vmem>>, vector<8x8xbf16>
    %c0_28 = arith.constant 0 : index
    %c56 = arith.constant 56 : index
    %71 = vector.load %arg13[%c0_28, %c56] : memref<8x64xbf16, #tpu.memory_space<vmem>>, vector<8x8xbf16>
    %cst_29 = arith.constant dense<0.000000e+00> : vector<8x8xf32>
    %72 = tpu.matmul %69, %70, %cst_29 {dimension_numbers = #tpu.dot_dimension_numbers<[1], [1], [0], [0], [0, 0, 1, 0], [], []>} : vector<8x8xbf16>, vector<8x8xbf16>, vector<8x8xf32> -> vector<8x8xf32>
    %cst_30 = arith.constant dense<0xFF800000> : vector<8xf32>
    %73 = vector.multi_reduction <maximumf>, %72, %cst_30 [1] : vector<8x8xf32> to vector<8xf32>
    %74 = vector.shape_cast %73 : vector<8xf32> to vector<8x1xf32>
    %75 = vector.broadcast %74 : vector<8x1xf32> to vector<8x8xf32>
    %76 = arith.subf %72, %75 : vector<8x8xf32>
    %77 = math.exp %76 : vector<8x8xf32>
    %cst_31 = arith.constant dense<0.000000e+00> : vector<8xf32>
    %78 = vector.multi_reduction <add>, %77, %cst_31 [1] : vector<8x8xf32> to vector<8xf32>
    %79 = vector.shape_cast %78 : vector<8xf32> to vector<8x1xf32>
    %80 = vector.broadcast %79 : vector<8x1xf32> to vector<8x8xf32>
    %81 = arith.divf %77, %80 : vector<8x8xf32>
    %82 = arith.truncf %81 : vector<8x8xf32> to vector<8x8xbf16>
    %cst_32 = arith.constant dense<0.000000e+00> : vector<8x8xf32>
    %83 = tpu.matmul %82, %71, %cst_32 {dimension_numbers = #tpu.dot_dimension_numbers<[1], [0], [0], [1], [0, 0, 1, 1], [], []>} : vector<8x8xbf16>, vector<8x8xbf16>, vector<8x8xf32> -> vector<8x8xf32>
    %84 = arith.truncf %83 : vector<8x8xf32> to vector<8x8xbf16>
    %85 = tpu.concatenate %36, %52, %68, %84 in 1 : vector<8x8xbf16>, vector<8x8xbf16>, vector<8x8xbf16>, vector<8x8xbf16> -> vector<8x32xbf16>
    %c0_33 = arith.constant 0 : index
    %c0_34 = arith.constant 0 : index
    %86 = vector.load %arg6[%c0_33, %c0_34] : memref<32x32xbf16, #tpu.memory_space<vmem>>, vector<32x32xbf16>
    %cst_35 = arith.constant dense<0.000000e+00> : vector<8x32xf32>
    %87 = tpu.matmul %85, %86, %cst_35 {dimension_numbers = #tpu.dot_dimension_numbers<[1], [0], [0], [1], [0, 0, 1, 1], [], []>} : vector<8x32xbf16>, vector<32x32xbf16>, vector<8x32xf32> -> vector<8x32xf32>
    %88 = vector.broadcast %4 : vector<1x32xf32> to vector<8x32xf32>
    %89 = arith.addf %87, %88 : vector<8x32xf32>
    %90 = arith.addf %1, %89 : vector<8x32xf32>
    %cst_36 = arith.constant dense<0.000000e+00> : vector<8xf32>
    %91 = vector.multi_reduction <add>, %90, %cst_36 [1] : vector<8x32xf32> to vector<8xf32>
    %92 = vector.shape_cast %91 : vector<8xf32> to vector<8x1xf32>
    %cst_37 = arith.constant 3.200000e+01 : f32
    %93 = vector.broadcast %cst_37 : f32 to vector<8x1xf32>
    %94 = arith.divf %92, %93 : vector<8x1xf32>
    %95 = vector.broadcast %94 : vector<8x1xf32> to vector<8x32xf32>
    %96 = arith.subf %90, %95 : vector<8x32xf32>
    %97 = arith.mulf %96, %96 : vector<8x32xf32>
    %cst_38 = arith.constant dense<0.000000e+00> : vector<8xf32>
    %98 = vector.multi_reduction <add>, %97, %cst_38 [1] : vector<8x32xf32> to vector<8xf32>
    %99 = vector.shape_cast %98 : vector<8xf32> to vector<8x1xf32>
    %cst_39 = arith.constant 3.200000e+01 : f32
    %100 = vector.broadcast %cst_39 : f32 to vector<8x1xf32>
    %101 = arith.divf %99, %100 : vector<8x1xf32>
    %102 = vector.broadcast %94 : vector<8x1xf32> to vector<8x32xf32>
    %103 = arith.subf %90, %102 : vector<8x32xf32>
    %cst_40 = arith.constant 9.99999974E-6 : f32
    %104 = vector.broadcast %cst_40 : f32 to vector<8x1xf32>
    %105 = arith.addf %101, %104 : vector<8x1xf32>
    %106 = math.rsqrt %105 : vector<8x1xf32>
    %107 = vector.broadcast %106 : vector<8x1xf32> to vector<8x32xf32>
    %108 = arith.mulf %103, %107 : vector<8x32xf32>
    %109 = vector.broadcast %5 : vector<1x32xf32> to vector<8x32xf32>
    %110 = arith.mulf %108, %109 : vector<8x32xf32>
    %111 = vector.broadcast %6 : vector<1x32xf32> to vector<8x32xf32>
    %112 = arith.addf %110, %111 : vector<8x32xf32>
    %113 = arith.truncf %112 : vector<8x32xf32> to vector<8x32xbf16>
    %c0_41 = arith.constant 0 : index
    %c0_42 = arith.constant 0 : index
    %114 = vector.load %arg7[%c0_41, %c0_42] : memref<32x64xbf16, #tpu.memory_space<vmem>>, vector<32x64xbf16>
    %cst_43 = arith.constant dense<0.000000e+00> : vector<8x64xf32>
    %115 = tpu.matmul %113, %114, %cst_43 {dimension_numbers = #tpu.dot_dimension_numbers<[1], [0], [0], [1], [0, 0, 1, 1], [], []>} : vector<8x32xbf16>, vector<32x64xbf16>, vector<8x64xf32> -> vector<8x64xf32>
    %c0_44 = arith.constant 0 : index
    %c0_45 = arith.constant 0 : index
    %116 = vector.load %arg11[%c0_44, %c0_45] : memref<1x64xf32, #tpu.memory_space<vmem>>, vector<1x64xf32>
    %117 = vector.broadcast %116 : vector<1x64xf32> to vector<8x64xf32>
    %118 = arith.addf %115, %117 : vector<8x64xf32>
    %cst_46 = arith.constant 0.000000e+00 : f32
    %119 = vector.broadcast %cst_46 : f32 to vector<8x64xf32>
    %120 = arith.maximumf %118, %119 : vector<8x64xf32>
    %121 = arith.truncf %120 : vector<8x64xf32> to vector<8x64xbf16>
    %c0_47 = arith.constant 0 : index
    %c0_48 = arith.constant 0 : index
    %122 = vector.load %arg8[%c0_47, %c0_48] : memref<64x32xbf16, #tpu.memory_space<vmem>>, vector<64x32xbf16>
    %cst_49 = arith.constant dense<0.000000e+00> : vector<8x32xf32>
    %123 = tpu.matmul %121, %122, %cst_49 {dimension_numbers = #tpu.dot_dimension_numbers<[1], [0], [0], [1], [0, 0, 1, 1], [], []>} : vector<8x64xbf16>, vector<64x32xbf16>, vector<8x32xf32> -> vector<8x32xf32>
    %124 = vector.broadcast %7 : vector<1x32xf32> to vector<8x32xf32>
    %125 = arith.addf %123, %124 : vector<8x32xf32>
    %126 = arith.addf %112, %125 : vector<8x32xf32>
    %cst_50 = arith.constant dense<0.000000e+00> : vector<8xf32>
    %127 = vector.multi_reduction <add>, %126, %cst_50 [1] : vector<8x32xf32> to vector<8xf32>
    %128 = vector.shape_cast %127 : vector<8xf32> to vector<8x1xf32>
    %cst_51 = arith.constant 3.200000e+01 : f32
    %129 = vector.broadcast %cst_51 : f32 to vector<8x1xf32>
    %130 = arith.divf %128, %129 : vector<8x1xf32>
    %131 = vector.broadcast %130 : vector<8x1xf32> to vector<8x32xf32>
    %132 = arith.subf %126, %131 : vector<8x32xf32>
    %133 = arith.mulf %132, %132 : vector<8x32xf32>
    %cst_52 = arith.constant dense<0.000000e+00> : vector<8xf32>
    %134 = vector.multi_reduction <add>, %133, %cst_52 [1] : vector<8x32xf32> to vector<8xf32>
    %135 = vector.shape_cast %134 : vector<8xf32> to vector<8x1xf32>
    %cst_53 = arith.constant 3.200000e+01 : f32
    %136 = vector.broadcast %cst_53 : f32 to vector<8x1xf32>
    %137 = arith.divf %135, %136 : vector<8x1xf32>
    %138 = vector.broadcast %130 : vector<8x1xf32> to vector<8x32xf32>
    %139 = arith.subf %126, %138 : vector<8x32xf32>
    %cst_54 = arith.constant 9.99999974E-6 : f32
    %140 = vector.broadcast %cst_54 : f32 to vector<8x1xf32>
    %141 = arith.addf %137, %140 : vector<8x1xf32>
    %142 = math.rsqrt %141 : vector<8x1xf32>
    %143 = vector.broadcast %142 : vector<8x1xf32> to vector<8x32xf32>
    %144 = arith.mulf %139, %143 : vector<8x32xf32>
    %145 = vector.broadcast %8 : vector<1x32xf32> to vector<8x32xf32>
    %146 = arith.mulf %144, %145 : vector<8x32xf32>
    %147 = vector.broadcast %9 : vector<1x32xf32> to vector<8x32xf32>
    %148 = arith.addf %146, %147 : vector<8x32xf32>
    %c0_55 = arith.constant 0 : index
    %c0_56 = arith.constant 0 : index
    %c0_57 = arith.constant 0 : index
    %149 = vector.load %arg12[%c0_55, %c0_56, %c0_57] : memref<1x8x32xf32, #tpu.memory_space<vmem>>, vector<1x8x32xf32>
    %150 = vector.shape_cast %149 : vector<1x8x32xf32> to vector<8x32xf32>
    %151 = vector.shape_cast %148 : vector<8x32xf32> to vector<1x8x32xf32>
    tpu.vector_store %arg12[%c0_55, %c0_56, %c0_57], %151 {strides = array<i32>} : memref<1x8x32xf32, #tpu.memory_space<vmem>>, vector<1x8x32xf32>,
    return
  }
  func.func @transform_0(%arg0: i32, %arg1: i32) -> (i32, i32, i32) {
    %c0_i32 = arith.constant 0 : i32
    %c0_i32_0 = arith.constant 0 : i32
    return %arg0, %arg1, %c0_i32 : i32, i32, i32
  }
  func.func @transform_1(%arg0: i32, %arg1: i32) -> (i32, i32, i32) {
    %c0_i32 = arith.constant 0 : i32
    %c0_i32_0 = arith.constant 0 : i32
    %c0_i32_1 = arith.constant 0 : i32
    return %arg0, %c0_i32, %c0_i32_0 : i32, i32, i32
  }
  func.func @transform_2(%arg0: i32, %arg1: i32) -> (i32, i32) {
    %c0_i32 = arith.constant 0 : i32
    %c0_i32_0 = arith.constant 0 : i32
    %c0_i32_1 = arith.constant 0 : i32
    return %c0_i32, %c0_i32_0 : i32, i32
  }
  func.func @transform_3(%arg0: i32, %arg1: i32) -> (i32, i32) {
    %c0_i32 = arith.constant 0 : i32
    %c0_i32_0 = arith.constant 0 : i32
    %c0_i32_1 = arith.constant 0 : i32
    return %c0_i32, %c0_i32_0 : i32, i32
  }
  func.func @transform_4(%arg0: i32, %arg1: i32) -> (i32, i32) {
    %c0_i32 = arith.constant 0 : i32
    %c0_i32_0 = arith.constant 0 : i32
    %c0_i32_1 = arith.constant 0 : i32
    return %c0_i32, %c0_i32_0 : i32, i32
  }
  func.func @transform_5(%arg0: i32, %arg1: i32) -> (i32, i32) {
    %c0_i32 = arith.constant 0 : i32
    %c0_i32_0 = arith.constant 0 : i32
    %c0_i32_1 = arith.constant 0 : i32
    return %c0_i32, %c0_i32_0 : i32, i32
  }
  func.func @transform_6(%arg0: i32, %arg1: i32) -> (i32, i32) {
    %c0_i32 = arith.constant 0 : i32
    %c0_i32_0 = arith.constant 0 : i32
    %c0_i32_1 = arith.constant 0 : i32
    return %c0_i32, %c0_i32_0 : i32, i32
  }
  func.func @transform_7(%arg0: i32, %arg1: i32) -> (i32, i32) {
    %c0_i32 = arith.constant 0 : i32
    %c0_i32_0 = arith.constant 0 : i32
    %c0_i32_1 = arith.constant 0 : i32
    return %c0_i32, %c0_i32_0 : i32, i32
  }
  func.func @transform_8(%arg0: i32, %arg1: i32) -> (i32, i32) {
    %c0_i32 = arith.constant 0 : i32
    %c0_i32_0 = arith.constant 0 : i32
    %c0_i32_1 = arith.constant 0 : i32
    return %c0_i32, %c0_i32_0 : i32, i32
  }
  func.func @transform_9(%arg0: i32, %arg1: i32) -> (i32, i32) {
    %c0_i32 = arith.constant 0 : i32
    %c0_i32_0 = arith.constant 0 : i32
    %c0_i32_1 = arith.constant 0 : i32
    return %c0_i32, %c0_i32_0 : i32, i32
  }
  func.func @transform_10(%arg0: i32, %arg1: i32) -> (i32, i32, i32) {
    %c0_i32 = arith.constant 0 : i32
    %c0_i32_0 = arith.constant 0 : i32
    return %arg0, %arg1, %c0_i32 : i32, i32, i32
  }
}

</mosaic_0001>

<bundles_post_ra>
// kernel: tpu_custom_call.1
= control target key start
LH: loop header
LB: loop body
LE: loop exit
PB: predicated region body
PF: predicated region fallthrough
CT: control target
= control target key end

     0   :  { %6 = vsyncpa [#allocation3], 0  ;;  %s341_s0 = inlined_call_operand.hbm [shape: f32[8,128], index: 0, kind: input, shape index: {}]   ;;  %s342_s1 = inlined_call_operand.hbm [shape: f32[8,128], index: 1, kind: output, shape index: {}]  }
   0x1   :  { %7 = vsyncpa [#allocation4], 0  ;;  %s262_s6 = smov 0  }
   0x2 LB: > { %s145_s7 = sadd.s32 4294967295, %s248_s6   ;;  %p146_p0 = scmp.ge.s32.totalorder %s248_s6, 1  ;;  %s248_s6 = sphi %s262_s6, %s13_s6  }
   0x3   : > { %p60_p1 = scmp.lt.s32.totalorder %s248_s6, 3  ;;  %p276_p3 = scmp.eq.s32.totalorder %s145_s7, 0 }
   0x4   : > { %s250_s10 = smov [#allocation2]   ;;  %s180_s15 = scalar_lea.hbm %s341_s0, 128 }
   0x5   : > { %p270_p2 = pnand %p146_p0, %p60_p1  ;;  %s73_s11 = sshll.u32 %s250_s10, 4  ;;  %s74_s11 = int_to_ptr.vmem [resolvable:$true] %s73_s11 }
   0x6   : > { %s347_s9 = scalar_select %p276_p3, 1, 0 }
   0x7   : > { %s346_s8 = scalar_select %p270_p2, 1, 0 }
   0x8   : > { %p162_p4 = pneg %p270_p2  ;;  %p181_p6 = scmp.ne.s32.totalorder %s341_s0, %s180_s15 }
   0x9   : > { %p187_p10 = scmp.lt.u32.totalorder %s180_s15, %s341_s0 }
   0xa   : > { %p284_p5 = pnand %p276_p3, %p162_p4 }
   0xc   : > { %p182_p7 = pneg %p284_p5 }
   0xe   : > { %p183_p8 = pnand %p182_p7, %p181_p6 }
  0x10   : > { %p184_p9 = pneg %p183_p8 }
  0x12   : > { %p189_p11 = pnand %p187_p10, %p184_p9 }
  0x14   : > { %192 = shalt.err (!%p189_p11)
}
  0x15   : > { %s193_s20 = scalar_lea.vmem %s74_s11, 128  ;;  %p201_p1 = scmp.lt.s32.totalorder %s74_s11, %s74_s11 }
  0x16   : > { %p194_p12 = scmp.ne.s32.totalorder %s74_s11, %s193_s20  ;;  %p202_p4 = scmp.lt.s32.totalorder %s193_s20, %s193_s20 }
  0x18   : > { %p196_p13 = pnand %p194_p12, %p182_p7  ;;  %p203_p3 = por %p202_p4, %p201_p1 }
  0x1a   : > { %p197_p0 = pneg %p196_p13 }
  0x1c   : > { %p204_p2 = pnand %p203_p3, %p197_p0 }
  0x1e   : > { %207 = shalt.err (!%p204_p2)
}
  0x1f   : > { %165 = dma.hbm_to_vmem [thread:$0]  (!%p284_p5), %s341_s0, 128, %s74_s11, [#allocation3]  }
  0x20   : > { %p349_p6 = scmp.ne.s32.totalorder %s346_s8, 0 }
  0x21   : > { %p350_p8 = scmp.ne.s32.totalorder (!%p349_p6), %s347_s9, 0 }
  0x22   : > { %86 = sbr.rel (%p349_p6) target bundleno = 67 (0x43), region = 24 }
  0x29   : > { %239 = dma.done.wait (%p350_p8), [#allocation3], 128  }
  0x2a   : > { %241 = vsyncadd (%p350_p8), [#allocation3], 4294967168  ;;  %s251_s23 = smov [#allocation5]   ;;  %v96_v0 = vld [vmem:[#allocation2] sm:$0xff]  ;;  %p312_p2 = scmp.eq.s32.totalorder %s145_s7, 1 }
  0x2b   : > { %s106_s24 = sshll.u32 %s251_s23, 4  ;;  %v97_v1 = vadd.f32 1.0, %v96_v0  ;;  %s107_s24 = int_to_ptr.vmem [resolvable:$true] %s106_s24 }
  0x2c   : > { %s208_s26 = scalar_lea.vmem %s107_s24, 128  ;;  %p215_p9 = scmp.lt.s32.totalorder %s107_s24, %s107_s24 }
  0x2d   : > { %98 = vst [vmem:[#allocation5] sm:$0xff] %v97_v1  ;;  %p209_p3 = scmp.ne.s32.totalorder %s107_s24, %s208_s26  ;;  %p216_p10 = scmp.lt.s32.totalorder %s208_s26, %s208_s26 }
  0x2f   : > { %p210_p5 = pnand %p209_p3, %p312_p2  ;;  %p217_p11 = por %p216_p10, %p215_p9 }
  0x31   : > { %p211_p7 = pneg %p210_p5 }
  0x33   : > { %p218_p12 = pnand %p217_p11, %p211_p7 }
  0x35   : > { %221 = shalt.err (!%p218_p12)
}
  0x36   : > { %s222_s29 = scalar_lea.hbm %s342_s1, 128 }
  0x37   : > { %p223_p13 = scmp.ne.s32.totalorder %s342_s1, %s222_s29  ;;  %p228_p4 = scmp.lt.u32.totalorder %s222_s29, %s342_s1 }
  0x39   : > { %p224_p0 = pnand %p223_p13, %p312_p2 }
  0x3b   : > { %p225_p1 = pneg %p224_p0 }
  0x3d   : > { %p230_p6 = pnand %p228_p4, %p225_p1 }
  0x3f   : > { %233 = shalt.err (!%p230_p6)
}
  0x40   : > { %159 = dma.vmem_to_hbm [thread:$0]  (%p312_p2), %s107_s24, 128, %s342_s1, [#allocation4]  }
  0x41   : > { %243 = dma.done.wait (%p312_p2), [#allocation4], 128  }
  0x42   : > { %245 = vsyncadd (%p312_p2), [#allocation4], 4294967168 }
  0x43 PF: > { %s13_s6 = sadd.s32 1, %s248_s6  }
  0x44   : > { %p10_p8 = scmp.ge.s32.totalorder %s13_s6, 4  }
  0x46   :  { %12 = sbr.rel (!%p10_p8) target bundleno = 2 (0x2), region = 53 }
  0x4d   :  { %119 = vsyncpa [#allocation3], 1 }
  0x4e   :  { %121 = vsyncpa [#allocation3 + $0x1], 1 }
  0x4f   :  { %122 = vsyncpa [#allocation4], 1 }
  0x50   :  { %124 = vsyncpa [#allocation4 + $0x1], 1 }

// kernel: encoder_forward.2
= control target key start
LH: loop header
LB: loop body
LE: loop exit
PB: predicated region body
PF: predicated region fallthrough
CT: control target
= control target key end

     0   :  { %15 = vsyncpa [#allocation4], 0  ;;  %s1755_s13 = smov 0   ;;  %s1757_s14 = smov 0   ;;  %s1996_s0 = inlined_call_operand.vmem [shape: f32[2,8,32], index: 0, kind: input, shape index: {}]   ;;  %s1997_s1 = inlined_call_operand.vmem [shape: bf16[2,8,32], index: 1, kind: input, shape index: {}]   ;;  %s1998_s2 = inlined_call_operand.vmem [shape: bf16[32,32], index: 2, kind: input, shape index: {}]   ;;  %s1999_s3 = inlined_call_operand.vmem [shape: bf16[32,64], index: 3, kind: input, shape index: {}]   ;;  %s2000_s4 = inlined_call_operand.vmem [shape: bf16[32,32], index: 4, kind: input, shape index: {}]   ;;  %s2001_s5 = inlined_call_operand.vmem [shape: bf16[32,64], index: 5, kind: input, shape index: {}]   ;;  %s2002_s6 = inlined_call_operand.vmem [shape: bf16[64,32], index: 6, kind: input, shape index: {}]   ;;  %s2003_s7 = inlined_call_operand.hbm [shape: f32[7,32], index: 7, kind: input, shape index: {}]   ;;  %s2004_s8 = inlined_call_operand.vmem [shape: f32[1,64], index: 8, kind: input, shape index: {}]   ;;  %s2005_s9 = inlined_call_operand.vmem [shape: f32[1,64], index: 9, kind: input, shape index: {}]   ;;  %s2006_s10 = inlined_call_operand.vmem [shape: f32[2,8,32], index: 10, kind: output, shape index: {}]  }
   0x1   :  { %s1759_s15 = smov 0  }
   0x2 LB: > { %s1386_s16 = sadd.s32 4294967295, %s1685_s15   ;;  %s33_s17 = sadd.s32 1, %s1681_s14  ;;  %s1685_s15 = sphi %s1759_s15, %s21_s15   ;;  %s1681_s14 = sphi %s1757_s14, %s2016_s14   ;;  %s1677_s13 = sphi %s1755_s13, %s2015_s13  }
   0x3   : > { %p35_p0 = scmp.ge.s32.totalorder %s33_s17, 2  ;;  %p1388_p1 = scmp.ge.s32.totalorder %s1685_s15, 1 }
   0x4   : > { %p288_p2 = scmp.lt.s32.totalorder %s1685_s15, 3  ;;  %p1780_p4 = scmp.eq.s32.totalorder %s1386_s16, 0 }
   0x5   : > { %s2018_s17 = smov (%p35_p0, %s33_s17), 0  ;;  %s1687_s20 = smov [#allocation3]  }
   0x6   : > { %p1776_p3 = pnand %p1388_p1, %p288_p2  ;;  %s316_s21 = sshll.u32 %s1687_s20, 4  ;;  %s317_s21 = int_to_ptr.vmem [resolvable:$true] %s316_s21 }
   0x7   : > { %s2011_s19 = scalar_select %p1780_p4, 1, 0 }
   0x8   : > { %s2010_s18 = scalar_select %p1776_p3, 1, 0 }
   0x9   : > { %p1555_p5 = pneg %p1776_p3  ;;  %s1631_s25 = scalar_lea.hbm %s2003_s7, 128 }
   0xa   : > { %p1632_p7 = scmp.ne.s32.totalorder %s2003_s7, %s1631_s25  ;;  %p1638_p11 = scmp.lt.u32.totalorder %s1631_s25, %s2003_s7 }
   0xb   : > { %p1788_p6 = pnand %p1780_p4, %p1555_p5 }
   0xd   : > { %p1633_p8 = pneg %p1788_p6 }
   0xf   : > { %p1634_p9 = pnand %p1633_p8, %p1632_p7 }
  0x11   : > { %p1635_p10 = pneg %p1634_p9 }
  0x13   : > { %p1640_p12 = pnand %p1638_p11, %p1635_p10 }
  0x15   : > { %1643 = shalt.err (!%p1640_p12)
}
  0x16   : > { %s1644_s30 = scalar_lea.vmem %s317_s21, 128  ;;  %p1652_p2 = scmp.lt.s32.totalorder %s317_s21, %s317_s21 }
  0x17   : > { %p1645_p13 = scmp.ne.s32.totalorder %s317_s21, %s1644_s30  ;;  %p1653_p5 = scmp.lt.s32.totalorder %s1644_s30, %s1644_s30 }
  0x19   : > { %p1647_p0 = pnand %p1645_p13, %p1633_p8  ;;  %p1654_p4 = por %p1653_p5, %p1652_p2 }
  0x1b   : > { %p1648_p1 = pneg %p1647_p0 }
  0x1d   : > { %p1655_p3 = pnand %p1654_p4, %p1648_p1 }
  0x1f   : > { %1658 = shalt.err (!%p1655_p3)
}
  0x20   : > { %1558 = dma.hbm_to_vmem [thread:$0]  (!%p1788_p6), %s2003_s7, 128, %s317_s21, [#allocation4]  }
  0x21   : > { %p2013_p7 = scmp.ne.s32.totalorder %s2010_s18, 0 }
  0x22   : > { %p2014_p9 = scmp.ne.s32.totalorder (!%p2013_p7), %s2011_s19, 0 }
  0x23   : > { %352 = sbr.rel (%p2013_p7) target bundleno = 2564 (0xa04), region = 60 }
  0x2a   : > { %1672 = dma.done.wait (%p2014_p9), [#allocation4], 128  }
  0x2b   : > { %1674 = vsyncadd (%p2014_p9), [#allocation4], 4294967168  ;;  %p398_p8 = scmp.lt.s32.totalorder %s1677_s13, 1  ;;  %v1688_v0 = vmov 0.0   ;;  %vm1689_vm0 = vmmov 0   ;;  %v1598_v1 = vld [vmem:[%s1999_s3] sm:$0xff]   ;;  %v499_v8 = vlaneseq }
  0x2c   : > { %1459 = vmatprep.subr.bf16.mxu1 %v1688_v0  ;;  %1463 = vmatprep.mubr.msk.bf16.mxu1 %vm1689_vm0, %v1688_v0  ;;  %v1599_v2 = vld [vmem:[%s1999_s3 + $0x8] sm:$0xff]   ;;  %vm447_vm1 = vcmask 261120   ;;  %v1600_v4 = vld [vmem:[%s1998_s2] sm:$0xff]   ;;  %vm492_vm2 = vcmask 519168   ;;  %vm562_vm3 = vcmask 64512   ;;  %s1690_s19 = smov 112  }
  0x2d   : > { %s2020_s13 = smov (!%p398_p8, %s1677_s13), 1  ;;  %1475 = vmatprep.subr.bf16.mxu0 %v1688_v0  ;;  %1477 = vmatprep.mubr.msk.bf16.mxu0 %vm1689_vm0, %v1688_v0  ;;  %v1601_v6 = vld [vmem:[%s1998_s2 + $0x8] sm:$0xff]   ;;  %v1860_v9 = vshrl.u32 %v499_v8, 7  ;;  %v1396_v10 = vld [vmem:[%s2004_s8] ss:$0 sm:$0xff]  ;;  %s1691_s20 = smov 120  }
  0x2e   : > { %s1394_s16 = sshll.u32 %s2020_s13, 2  ;;  %1460 = vmatpush3.bf16.msra.mxu1 %v1598_v1  ;;  %s1393_s25 = sshll.u32 %s2020_s13, 3  ;;  %v1866_v16 = vld [vmem:[#allocation3] sm:$0x7f]  ;;  %vm629_vm4 = vcmask 1043456   ;;  %vm1020_vm5 = vcmask 130048  }
  0x2f   : > { %s408_s22 = scalar_lea.vmem %s1997_s1, %s1394_s16  ;;  %1461 = vmatprep.subr.bf16.mxu1 %v1688_v0  ;;  %s404_s30 = scalar_lea.vmem %s1996_s0, %s1393_s25  ;;  %v501_v14 = vsub.s32 0, %v1860_v9  ;;  %vm1023_vm6 = vcmask 195584   ;;  %vm1218_vm7 = vcmask 523264  }
  0x30   : > { %v423_v3 = vld [vmem:[%s408_s22] sm:$0xf]  ;;  %s1692_s21 = smov 104   ;;  %s1693_s22 = smov 96  }
  0x31   : > { %v1846_v5 = vld [vmem:[%s404_s30] sm:$0xff]  ;;  %v502_v19 = vrot.slane %v1866_v16, %v501_v14  ;;  %s1694_s23 = smov 80   ;;  %s1695_s24 = smov 72  }
  0x32   : > { %1462 = vmatpush3.bf16.msra.mxu1 %v1599_v2  ;;  %v494_v7 = vpack.c.bf16 %v1846_v5, %v1846_v5  ;;  %s1696_s26 = smov 88   ;;  %s1697_s11 = smov 8  }
  0x33   : > { %1467 = vmatprep.subr.bf16.mxu1 %v1688_v0  ;;  %s1698_s12 = smov 16   ;;  %s1699_s16 = smov 24  }
  0x35   : > { %1464 = vmatmul.mubr.msk.bf16.vlgmr.msra.gmra.mrb[0].mxu1 %vm447_vm1, %v423_v3 }
  0x36   : > { %1468 = vmatpush3.bf16.msra.mxu1 %v1600_v4  ;;  %1471 = vmatprep.mubr.msk.bf16.mxu1 %vm1689_vm0, %v1688_v0 }
  0x37   : > { %1469 = vmatprep.subr.bf16.mxu1 %v1688_v0 }
  0x3a   : > { %1470 = vmatpush3.bf16.msra.mxu1 %v1601_v6 }
  0x3b   : > { %1481 = vmatprep.subr.bf16.mxu1 %v1688_v0 }
  0x3d   : > { %1472 = vmatmul.mubr.msk.bf16.vlgmr.msra.gmra.mrb[4].mxu1 %vm447_vm1, %v494_v7 }
  0x3e   : > { %1483 = vmatprep.mubr.msk.bf16.mxu1 %vm1689_vm0, %v1688_v0 }
 0x108   : > { %v485_v11 = vpop.f32.mrb[0].mxu1 }
 0x109   : > { %v486_v12 = vadd.f32 %v1396_v10, %v485_v11  ;;  %v1465_v13 = vpop.f32.mrb[1].mxu1 }
 0x10a   : > { %v488_v15 = vpop.f32.mrb[2].mxu1 }
 0x10b   : > { %v491_v17 = vpack.c.bf16 %v486_v12, %v486_v12  ;;  %v1466_v18 = vpop.f32.mrb[3].mxu1 }
 0x10d   : > { %493 = vst.msk [vmem:[#allocation2] sm:$0xf] %vm492_vm2, %v491_v17 }
 0x110   : > { %v553_v20 = vpop.f32.mrb[4].mxu1 }
 0x111   : > { %v554_v21 = vadd.f32 %v553_v20, %v502_v19  ;;  %v1473_v22 = vpop.f32.mrb[5].mxu1 }
 0x112   : > { %v556_v23 = vpop.f32.mrb[6].mxu1 }
 0x113   : > { %v559_v24 = vmul.f32 0.35355338, %v554_v21  ;;  %v1474_v25 = vpop.f32.mrb[7].mxu1 }
 0x114   : > { %v561_v26 = vld [vmem:[#allocation2] sm:$0xf] }
 0x115   : > { %v567_v27 = vsel %vm562_vm3, %v561_v26, 0  ;;  %v1870_v28 = vcombine.low %v561_v26, %v561_v26  ;;  %v560_v29 = vpack.c.bf16 %v559_v24, %v559_v24 }
 0x116   : > { %1476 = vmatpush3.bf16.xpose.msra.mxu0 %v567_v27 }
 0x117   : > { %788 = vrot.lane.b32.xlu1 %v1870_v28, %s1690_s19  ;;  %677 = vrot.lane.b32.xlu0 %v1870_v28, %s1691_s20 }
 0x118   : > { %1487 = vmatprep.subr.bf16.mxu0 %v1688_v0 }
 0x11b   : > { %786 = vrot.lane.b32.xlu1 %v560_v29, %s1690_s19  ;;  %675 = vrot.lane.b32.xlu0 %v560_v29, %s1691_s20  ;;  %s415_s19 = scalar_lea.vmem %s2006_s10, %s1393_s25 }
 0x11d   : > { %1478 = vmatmul.mubr.msk.bf16.vlgmr.msra.gmra.mrb[0].mxu0 %vm562_vm3, %v560_v29 }
 0x11e   : > { %1489 = vmatprep.mubr.msk.bf16.mxu0 %vm1689_vm0, %v1688_v0 }
 0x11f   : > { %897 = vrot.lane.b32.xlu1 %v560_v29, %s1692_s21  ;;  %899 = vrot.lane.b32.xlu0 %v1870_v28, %s1692_s21 }
 0x189   : > { %v678_v30 = vpop.permute.xlu0 %677  ;;  %v789_v32 = vpop.permute.xlu1 %788 }
 0x18a   : > { %v683_v31 = vsel %vm562_vm3, %v678_v30, 0  ;;  %v794_v34 = vsel %vm562_vm3, %v789_v32, 0 }
 0x18b   : > { %1488 = vmatpush3.bf16.xpose.msra.mxu0 %v683_v31 }
 0x18c   : > { %1499 = vmatprep.subr.bf16.mxu0 %v1688_v0 }
 0x18d   : > { %v676_v33 = vpop.permute.xlu0 %675  ;;  %v787_v36 = vpop.permute.xlu1 %786 }
 0x191   : > { %v900_v35 = vpop.permute.xlu0 %899  ;;  %v898_v38 = vpop.permute.xlu1 %897 }
 0x192   : > { %1490 = vmatmul.mubr.msk.bf16.vlgmr.msra.gmra.mrb[4].mxu0 %vm562_vm3, %v676_v33  ;;  %v905_v37 = vsel %vm562_vm3, %v900_v35, 0 }
 0x193   : > { %1500 = vmatpush3.bf16.xpose.msra.mxu0 %v794_v34  ;;  %1501 = vmatprep.mubr.msk.bf16.mxu0 %vm1689_vm0, %v1688_v0 }
 0x194   : > { %1511 = vmatprep.subr.bf16.mxu0 %v1688_v0 }
 0x19a   : > { %1502 = vmatmul.mubr.msk.bf16.vlgmr.msra.gmra.mrb[8].mxu0 %vm562_vm3, %v787_v36 }
 0x19b   : > { %1512 = vmatpush3.bf16.xpose.msra.mxu0 %v905_v37  ;;  %1513 = vmatprep.mubr.msk.bf16.mxu0 %vm1689_vm0, %v1688_v0 }
 0x19c   : > { %1523 = vmatprep.subr.bf16.mxu0 %v1688_v0 }
 0x1a2   : > { %1514 = vmatmul.mubr.msk.bf16.vlgmr.msra.gmra.mrb[12].mxu0 %vm562_vm3, %v898_v38 }
 0x1a3   : > { %1527 = vmatprep.mubr.msk.bf16.mxu0 %vm1689_vm0, %v1688_v0 }
 0x1f0   : > { %v603_v39 = vpop.f32.mrb[0].mxu0 }
 0x1f1   : > { %v1479_v40 = vpop.f32.mrb[1].mxu0  ;;  %v609_v41 = vsel %vm562_vm3, %v603_v39, -inf }
 0x1f2   : > { %610 = vmax.xlane.f32.xlu0 %v609_v41  ;;  %v606_v42 = vpop.f32.mrb[2].mxu0 }
 0x1f3   : > { %v1480_v43 = vpop.f32.mrb[3].mxu0 }
 0x265   : > { %v719_v44 = vpop.f32.mrb[4].mxu0 }
 0x266   : > { %v1491_v45 = vpop.f32.mrb[5].mxu0  ;;  %v725_v46 = vsel %vm562_vm3, %v719_v44, -inf }
 0x267   : > { %726 = vmax.xlane.f32.xlu1 %v725_v46  ;;  %v722_v47 = vpop.f32.mrb[6].mxu0 }
 0x268   : > { %v1492_v48 = vpop.f32.mrb[7].mxu0  ;;  %v1603_v47 = vld [vmem:[%s2000_s4] sm:$0xff]  }
 0x269   : > { %1524 = vmatpush3.bf16.msra.mxu0 %v1603_v47 }
 0x26a   : > { %1525 = vmatprep.subr.bf16.mxu0 %v1688_v0 }
 0x26d   : > { %v830_v49 = vpop.f32.mrb[8].mxu0 }
 0x26e   : > { %v1503_v50 = vpop.f32.mrb[9].mxu0  ;;  %v836_v51 = vsel %vm562_vm3, %v830_v49, -inf }
 0x26f   : > { %837 = vmax.xlane.f32.xlu0 %v836_v51  ;;  %v833_v52 = vpop.f32.mrb[10].mxu0 }
 0x270   : > { %v1504_v53 = vpop.f32.mrb[11].mxu0 }
 0x275   : > { %v941_v54 = vpop.f32.mrb[12].mxu0 }
 0x276   : > { %v1515_v55 = vpop.f32.mrb[13].mxu0  ;;  %v947_v56 = vsel %vm562_vm3, %v941_v54, -inf }
 0x277   : > { %948 = vmax.xlane.f32.xlu0 %v947_v56  ;;  %v944_v57 = vpop.f32.mrb[14].mxu0 }
 0x278   : > { %v1516_v58 = vpop.f32.mrb[15].mxu0 }
 0x27f   : > { %v611_v59 = vpop.xlane.xlu0 %610 }
 0x280   : > { %v612_v60 = vsub.f32 %v603_v39, %v611_v59 }
 0x282   : > { %v613_v61 = vmul.f32 1.442695, %v612_v60 }
 0x284   : > { %1611 = vpow2.f32 %v613_v61 }
 0x28e   : > { %v1612_v62 = vpop.eup %1611 }
 0x28f   : > { %v615_v63 = vsel %vm562_vm3, %v1612_v62, 0.0 }
 0x290   : > { %616 = vadd.xlane.f32.xlu1 %v615_v63 }
 0x2a1   : > { %624 = vrot.lane.b32.xlu1 %v1870_v28, %s1693_s22 }
 0x2f4   : > { %v727_v1 = vpop.xlane.xlu1 %726 }
 0x2f5   : > { %v728_v2 = vsub.f32 %v719_v44, %v727_v1 }
 0x2f7   : > { %v729_v3 = vmul.f32 1.442695, %v728_v2 }
 0x2f9   : > { %1613 = vpow2.f32 %v729_v3 }
 0x2fc   : > { %v838_v4 = vpop.xlane.xlu0 %837 }
 0x2fd   : > { %v839_v6 = vsub.f32 %v830_v49, %v838_v4  ;;  %v1604_v49 = vld [vmem:[%s2000_s4 + $0x8] sm:$0xff]  }
 0x2fe   : > { %1526 = vmatpush3.bf16.msra.mxu0 %v1604_v49 }
 0x2ff   : > { %v840_v7 = vmul.f32 1.442695, %v839_v6  ;;  %1539 = vmatprep.subr.bf16.mxu0 %v1688_v0 }
 0x301   : > { %1615 = vpow2.f32 %v840_v7 }
 0x303   : > { %v1614_v8 = vpop.eup %1613 }
 0x304   : > { %v949_v10 = vpop.xlane.xlu0 %948  ;;  %v731_v11 = vsel %vm562_vm3, %v1614_v8, 0.0 }
 0x305   : > { %v950_v12 = vsub.f32 %v941_v54, %v949_v10  ;;  %732 = vadd.xlane.f32.xlu0 %v731_v11  ;;  %v1032_v10 = vsub.s32 1, %v1860_v9 }
 0x307   : > { %v951_v13 = vmul.f32 1.442695, %v950_v12  ;;  %v1033_v11 = vrot.slane %v1866_v16, %v1032_v10 }
 0x309   : > { %1617 = vpow2.f32 %v951_v13 }
 0x30b   : > { %v1616_v14 = vpop.eup %1615 }
 0x30c   : > { %v842_v15 = vsel %vm562_vm3, %v1616_v14, 0.0 }
 0x30d   : > { %843 = vadd.xlane.f32.xlu1 %v842_v15 }
 0x313   : > { %v1618_v17 = vpop.eup %1617 }
 0x314   : > { %v953_v18 = vsel %vm562_vm3, %v1618_v17, 0.0 }
 0x315   : > { %954 = vadd.xlane.f32.xlu0 %v953_v18 }
 0x31d   : > { %v617_v19 = vpop.xlane.xlu1 %616 }
 0x31e   : > { %1619 = vrcp.f32 %v617_v19  ;;  %848 = vrot.lane.b32.xlu1 %v1870_v28, %s1694_s23 }
 0x321   : > { %v625_v20 = vpop.permute.xlu1 %624 }
 0x322   : > { %v631_v21 = vsel %vm629_vm4, %v625_v20, 0  ;;  %959 = vrot.lane.b32.xlu1 %v1870_v28, %s1695_s24 }
 0x323   : > { %1482 = vmatpush3.bf16.msra.mxu1 %v631_v21 }
 0x324   : > { %1493 = vmatprep.subr.bf16.mxu1 %v1688_v0 }
 0x328   : > { %v1620_v22 = vpop.eup %1619 }
 0x329   : > { %v619_v23 = vmul.f32 %v1620_v22, %v1612_v62 }
 0x32b   : > { %737 = vrot.lane.b32.xlu0 %v1870_v28, %s1696_s26  ;;  %v620_v24 = vpack.c.bf16 %v619_v23, %v619_v23 }
 0x32d   : > { %1484 = vmatmul.mubr.msk.bf16.vlgmr.msra.gmra.mrb[8].mxu1 %vm562_vm3, %v620_v24 }
 0x32e   : > { %1495 = vmatprep.mubr.msk.bf16.mxu1 %vm1689_vm0, %v1688_v0 }
 0x392   : > { %v733_v25 = vpop.xlane.xlu0 %732 }
 0x393   : > { %1621 = vrcp.f32 %v733_v25  ;;  %v1605_v25 = vld [vmem:[%s2001_s5] sm:$0xff]  }
 0x39a   : > { %v844_v26 = vpop.xlane.xlu1 %843 }
 0x39b   : > { %1623 = vrcp.f32 %v844_v26  ;;  %v1606_v26 = vld [vmem:[%s2001_s5 + $0x8] sm:$0xff]  }
 0x39d   : > { %v1622_v27 = vpop.eup %1621 }
 0x39e   : > { %v735_v30 = vmul.f32 %v1622_v27, %v1614_v8  ;;  %v849_v33 = vpop.permute.xlu1 %848  ;;  %v1608_v27 = vld [vmem:[%s2002_s6 + $0x8] sm:$0xff]  }
 0x39f   : > { %v854_v35 = vsel %vm629_vm4, %v849_v33, 0  ;;  %v1110_v33 = vsub.s32 3, %v1860_v9 }
 0x3a0   : > { %v736_v28 = vpack.c.bf16 %v735_v30, %v735_v30 }
 0x3a2   : > { %v955_v29 = vpop.xlane.xlu0 %954  ;;  %v960_v37 = vpop.permute.xlu1 %959 }
 0x3a3   : > { %1625 = vrcp.f32 %v955_v29  ;;  %v965_v40 = vsel %vm629_vm4, %v960_v37, 0 }
 0x3a5   : > { %v1624_v34 = vpop.eup %1623 }
 0x3a6   : > { %v738_v31 = vpop.permute.xlu0 %737  ;;  %v846_v36 = vmul.f32 %v1624_v34, %v1616_v14 }
 0x3a7   : > { %v743_v32 = vsel %vm629_vm4, %v738_v31, 0 }
 0x3a8   : > { %1494 = vmatpush3.bf16.msra.mxu1 %v743_v32  ;;  %v847_v38 = vpack.c.bf16 %v846_v36, %v846_v36  ;;  %v1105_v32 = vsub.s32 2, %v1860_v9  ;;  %v1111_v36 = vrot.slane %v1866_v16, %v1110_v33 }
 0x3a9   : > { %1505 = vmatprep.subr.bf16.mxu1 %v1688_v0 }
 0x3ab   : > { %1496 = vmatmul.mubr.msk.bf16.vlgmr.msra.gmra.mrb[12].mxu1 %vm562_vm3, %v736_v28  ;;  %v1106_v28 = vrot.slane %v1866_v16, %v1105_v32 }
 0x3ac   : > { %1506 = vmatpush3.bf16.msra.mxu1 %v854_v35  ;;  %1507 = vmatprep.mubr.msk.bf16.mxu1 %vm1689_vm0, %v1688_v0 }
 0x3ad   : > { %1517 = vmatprep.subr.bf16.mxu1 %v1688_v0  ;;  %v1626_v39 = vpop.eup %1625 }
 0x3ae   : > { %v957_v41 = vmul.f32 %v1626_v39, %v1618_v17 }
 0x3b0   : > { %v958_v42 = vpack.c.bf16 %v957_v41, %v957_v41  ;;  %v1610_v41 = vld [vmem:[%s2002_s6 + $0x18] sm:$0xff]  }
 0x3b3   : > { %1508 = vmatmul.mubr.msk.bf16.vlgmr.msra.gmra.mrb[16].mxu1 %vm562_vm3, %v847_v38 }
 0x3b4   : > { %1518 = vmatpush3.bf16.msra.mxu1 %v965_v40  ;;  %1519 = vmatprep.mubr.msk.bf16.mxu1 %vm1689_vm0, %v1688_v0  ;;  %v1609_v40 = vld [vmem:[%s2002_s6 + $0x10] sm:$0xff]  }
 0x3b5   : > { %1531 = vmatprep.subr.bf16.mxu1 %v1688_v0 }
 0x3bb   : > { %1520 = vmatmul.mubr.msk.bf16.vlgmr.msra.gmra.mrb[20].mxu1 %vm562_vm3, %v958_v42  ;;  %v1415_v42 = vld [vmem:[%s2005_s9] ss:$0 sm:$0xff] }
 0x3bc   : > { %1535 = vmatprep.mubr.msk.bf16.mxu1 %vm1689_vm0, %v1688_v0  ;;  %1532 = vmatpush3.bf16.msra.mxu1 %v1605_v25 }
 0x3bd   : > { %1533 = vmatprep.subr.bf16.mxu1 %v1688_v0 }
 0x3c0   : > { %1534 = vmatpush3.bf16.msra.mxu1 %v1606_v26 }
 0x400   : > { %v667_v43 = vpop.f32.mrb[8].mxu1 }
 0x401   : > { %v1485_v44 = vpop.f32.mrb[9].mxu1  ;;  %v673_v2 = vpack.c.bf16 %v667_v43, %v667_v43 }
 0x402   : > { %v670_v45 = vpop.f32.mrb[10].mxu1 }
 0x403   : > { %v1486_v46 = vpop.f32.mrb[11].mxu1 }
 0x47e   : > { %v779_v48 = vpop.f32.mrb[12].mxu1 }
 0x47f   : > { %v785_v50 = vpack.c.bf16 %v779_v48, %v779_v48  ;;  %v1497_v51 = vpop.f32.mrb[13].mxu1 }
 0x480   : > { %v782_v52 = vpop.f32.mrb[14].mxu1 }
 0x481   : > { %1009 = vrot.lane.b32.xlu0 %v785_v50, %s1697_s11  ;;  %v1498_v53 = vpop.f32.mrb[15].mxu1 }
 0x486   : > { %v890_v54 = vpop.f32.mrb[16].mxu1 }
 0x487   : > { %v896_v55 = vpack.c.bf16 %v890_v54, %v890_v54  ;;  %v1509_v56 = vpop.f32.mrb[17].mxu1 }
 0x488   : > { %v893_v57 = vpop.f32.mrb[18].mxu1 }
 0x489   : > { %1012 = vrot.lane.b32.xlu1 %v896_v55, %s1698_s12  ;;  %v1510_v58 = vpop.f32.mrb[19].mxu1 }
 0x48e   : > { %v1001_v59 = vpop.f32.mrb[20].mxu1 }
 0x48f   : > { %v1007_v60 = vpack.c.bf16 %v1001_v59, %v1001_v59  ;;  %v1521_v61 = vpop.f32.mrb[21].mxu1 }
 0x490   : > { %v1004_v62 = vpop.f32.mrb[22].mxu1 }
 0x491   : > { %1015 = vrot.lane.b32.xlu0 %v1007_v60, %s1699_s16  ;;  %v1522_v63 = vpop.f32.mrb[23].mxu1 }
 0x4f3   : > { %v1010_v1 = vpop.permute.xlu0 %1009 }
 0x4f4   : > { %v1019_v4 = vsel %vm562_vm3, %v673_v2, %v1010_v1 }
 0x4fb   : > { %v1013_v3 = vpop.permute.xlu1 %1012 }
 0x4fc   : > { %v1022_v6 = vsel %vm1020_vm5, %v1019_v4, %v1013_v3  ;;  %v1278_v3 = vsub.s32 5, %v1860_v9  ;;  %v1283_v4 = vsub.s32 6, %v1860_v9 }
 0x503   : > { %v1016_v7 = vpop.permute.xlu0 %1015 }
 0x504   : > { %v1025_v8 = vsel %vm1023_vm6, %v1022_v6, %v1016_v7  ;;  %v1279_v6 = vrot.slane %v1866_v16, %v1278_v3 }
 0x505   : > { %1528 = vmatmul.mubr.msk.bf16.vlgmr.msra.gmra.mrb[16].mxu0 %vm447_vm1, %v1025_v8  ;;  %v1284_v8 = vrot.slane %v1866_v16, %v1283_v4 }
 0x506   : > { %1547 = vmatprep.mubr.msk.bf16.mxu0 %vm1689_vm0, %v1688_v0 }
 0x5d8   : > { %v1082_v12 = vpop.f32.mrb[16].mxu0 }
 0x5d9   : > { %v1083_v13 = vadd.f32 %v1082_v12, %v1033_v11  ;;  %v1529_v14 = vpop.f32.mrb[17].mxu0 }
 0x5da   : > { %v1085_v15 = vpop.f32.mrb[18].mxu0 }
 0x5db   : > { %v1530_v17 = vpop.f32.mrb[19].mxu0  ;;  %v1088_v18 = vadd.f32 %v1083_v13, %v1846_v5  ;;  %v1607_v5 = vld [vmem:[%s2002_s6] sm:$0xff]  }
 0x5dc   : > { %1540 = vmatpush3.bf16.msra.mxu0 %v1607_v5 }
 0x5dd   : > { %v1089_v19 = vsel %vm447_vm1, %v1088_v18, 0.0  ;;  %1541 = vmatprep.subr.bf16.mxu0 %v1688_v0 }
 0x5de   : > { %1090 = vadd.xlane.f32.xlu1 %v1089_v19 }
 0x5e0   : > { %1542 = vmatpush3.bf16.msra.mxu0 %v1608_v27 }
 0x5e1   : > { %1543 = vmatprep.subr.bf16.mxu0 %v1688_v0 }
 0x5e4   : > { %1544 = vmatpush3.bf16.msra.mxu0 %v1609_v40 }
 0x5e5   : > { %1545 = vmatprep.subr.bf16.mxu0 %v1688_v0  ;;  %v1192_v0 = vsub.s32 4, %v1860_v9 }
 0x5e7   : > { %v1193_v50 = vrot.slane %v1866_v16, %v1192_v0 }
 0x5e8   : > { %1546 = vmatpush3.bf16.msra.mxu0 %v1610_v41 }
 0x66b   : > { %v1091_v20 = vpop.xlane.xlu1 %1090 }
 0x66c   : > { %v1093_v21 = vmul.f32 0.03125, %v1091_v20 }
 0x66e   : > { %v1094_v22 = vsub.f32 %v1088_v18, %v1093_v21 }
 0x670   : > { %v1095_v23 = vmul.f32 %v1094_v22, %v1094_v22 }
 0x672   : > { %v1096_v24 = vsel %vm447_vm1, %v1095_v23, 0.0 }
 0x673   : > { %1097 = vadd.xlane.f32.xlu0 %v1096_v24 }
 0x700   : > { %v1098_v29 = vpop.xlane.xlu0 %1097 }
 0x701   : > { %v1099_v30 = vmul.f32 0.03125, %v1098_v29 }
 0x703   : > { %v1100_v31 = vadd.f32 1e-05, %v1099_v30 }
 0x705   : > { %1627 = vrsqrt.f32 %v1100_v31 }
 0x70f   : > { %v1628_v34 = vpop.eup %1627 }
 0x710   : > { %v1102_v35 = vmul.f32 %v1628_v34, %v1094_v22 }
 0x712   : > { %v1107_v37 = vmul.f32 %v1106_v28, %v1102_v35 }
 0x714   : > { %v1112_v38 = vadd.f32 %v1111_v36, %v1107_v37 }
 0x716   : > { %v1113_v39 = vpack.c.bf16 %v1112_v38, %v1112_v38 }
 0x718   : > { %1536 = vmatmul.mubr.msk.bf16.vlgmr.msra.gmra.mrb[24].mxu1 %vm447_vm1, %v1113_v39 }
 0x7eb   : > { %v1174_v43 = vpop.f32.mrb[24].mxu1 }
 0x7ec   : > { %v1175_v44 = vadd.f32 %v1415_v42, %v1174_v43  ;;  %v1537_v45 = vpop.f32.mrb[25].mxu1 }
 0x7ed   : > { %v1177_v46 = vpop.f32.mrb[26].mxu1 }
 0x7ee   : > { %v1180_v47 = vmax.f32 %v1175_v44, 0.0  ;;  %v1538_v48 = vpop.f32.mrb[27].mxu1 }
 0x7f0   : > { %v1181_v49 = vpack.c.bf16 %v1180_v47, %v1180_v47 }
 0x7f2   : > { %1548 = vmatmul.mubr.msk.bf16.vlgmr.msra.gmra.mrb[20].mxu0 %vm1218_vm7, %v1181_v49 }
 0x8c5   : > { %v1256_v51 = vpop.f32.mrb[20].mxu0 }
 0x8c6   : > { %v1257_v52 = vadd.f32 %v1256_v51, %v1193_v50  ;;  %v1549_v53 = vpop.f32.mrb[21].mxu0 }
 0x8c7   : > { %v1259_v54 = vpop.f32.mrb[22].mxu0 }
 0x8c8   : > { %v1550_v55 = vpop.f32.mrb[23].mxu0  ;;  %v1262_v56 = vadd.f32 %v1257_v52, %v1112_v38 }
 0x8ca   : > { %v1263_v57 = vsel %vm447_vm1, %v1262_v56, 0.0 }
 0x8cb   : > { %1264 = vadd.xlane.f32.xlu0 %v1263_v57 }
 0x958   : > { %v1265_v58 = vpop.xlane.xlu0 %1264 }
 0x959   : > { %v1266_v59 = vmul.f32 0.03125, %v1265_v58 }
 0x95b   : > { %v1267_v60 = vsub.f32 %v1262_v56, %v1266_v59 }
 0x95d   : > { %v1268_v61 = vmul.f32 %v1267_v60, %v1267_v60 }
 0x95f   : > { %v1269_v62 = vsel %vm447_vm1, %v1268_v61, 0.0 }
 0x960   : > { %1270 = vadd.xlane.f32.xlu1 %v1269_v62 }
 0x9ed   : > { %v1271_v63 = vpop.xlane.xlu1 %1270 }
 0x9ee   : > { %v1272_v1 = vmul.f32 0.03125, %v1271_v63 }
 0x9f0   : > { %v1273_v2 = vadd.f32 1e-05, %v1272_v1 }
 0x9f2   : > { %1629 = vrsqrt.f32 %v1273_v2 }
 0x9fc   : > { %v1630_v7 = vpop.eup %1629 }
 0x9fd   : > { %v1275_v10 = vmul.f32 %v1630_v7, %v1267_v60 }
 0x9ff   : > { %v1280_v11 = vmul.f32 %v1279_v6, %v1275_v10 }
 0xa01   : > { %v1285_v12 = vadd.f32 %v1284_v8, %v1280_v11 }
 0xa03   : > { %1286 = vst.msk [vmem:[%s415_s19] sm:$0xff] %vm447_vm1, %v1285_v12 }
 0xa04 PF: > { %s21_s15 = sadd.s32 1, %s1685_s15   ;;  %s2015_s13 = smov %s1681_s14 }
 0xa05   : > { %p18_p3 = scmp.ge.s32.totalorder %s21_s15, 4   ;;  %s2016_s14 = smov %s2018_s17 }
 0xa07   :  { %20 = sbr.rel (!%p18_p3) target bundleno = 2 (0x2), region = 102 }
 0xa0e   :  { %1312 = vsyncpa [#allocation4], 1 }
 0xa0f   :  { %1314 = vsyncpa [#allocation4 + $0x1], 1 }

// kernel: encoder_forward.3
= control target key start
LH: loop header
LB: loop body
LE: loop exit
PB: predicated region body
PF: predicated region fallthrough
CT: control target
= control target key end

     0   :  { %s2051_s0 = inlined_call_operand.vmem [shape: f32[2,8,32], index: 0, kind: input, shape index: {}]   ;;  %s2052_s1 = inlined_call_operand.vmem [shape: bf16[2,8,32], index: 1, kind: input, shape index: {}]   ;;  %s2053_s2 = inlined_call_operand.vmem [shape: bf16[32,32], index: 2, kind: input, shape index: {}]   ;;  %s2054_s3 = inlined_call_operand.vmem [shape: bf16[32,64], index: 3, kind: input, shape index: {}]   ;;  %s2055_s4 = inlined_call_operand.vmem [shape: bf16[32,32], index: 4, kind: input, shape index: {}]   ;;  %s2056_s5 = inlined_call_operand.vmem [shape: bf16[32,64], index: 5, kind: input, shape index: {}]   ;;  %s2057_s6 = inlined_call_operand.vmem [shape: bf16[64,32], index: 6, kind: input, shape index: {}]   ;;  %s2058_s7 = inlined_call_operand.vmem [shape: f32[7,32], index: 7, kind: input, shape index: {}]   ;;  %s2059_s8 = inlined_call_operand.vmem [shape: f32[1,64], index: 8, kind: input, shape index: {}]   ;;  %s2060_s9 = inlined_call_operand.vmem [shape: f32[1,64], index: 9, kind: input, shape index: {}]   ;;  %s2061_s10 = inlined_call_operand.hbm [shape: f32[2,8,32], index: 10, kind: output, shape index: {}]  }
   0x1   :  { %2064 = sst [smem:[#allocation8_spill]] %s2054_s3 }
   0x2   :  { %15 = vsyncpa [#allocation4], 0 }
   0x3   :  { %17 = vsyncpa [#allocation4 + $0x1], 0  ;;  %s1779_s13 = smov 0   ;;  %s1781_s14 = smov 0  }
   0x4   :  { %s1783_s15 = smov 0   ;;  %s1785_s16 = smov 0  }
   0x5   :  { %s1787_s17 = smov 0   ;;  %s1789_s18 = smov 0  }
   0x6 LB: > { %2065 = sst [smem:[#allocation6_spill]] %s1705_s17  ;;  %s1366_s19 = sadd.s32 4294967295, %s1709_s18   ;;  %s1709_s18 = sphi %s1789_s18, %s23_s18   ;;  %s1705_s17 = sphi %s1787_s17, %s2071_s17   ;;  %s1701_s16 = sphi %s1785_s16, %s2070_s16   ;;  %s1697_s15 = sphi %s1783_s15, %s2074_s15   ;;  %s1693_s14 = sphi %s1781_s14, %s2073_s14   ;;  %s1689_s13 = sphi %s1779_s13, %s2072_s13  }
   0x7   : > { %s1367_s20 = sadd.s32 4294967294, %s1709_s18   ;;  %s35_s21 = sadd.s32 1, %s1705_s17 }
   0x8   : > { %s266_s22 = sadd.s32 1, %s1697_s15  ;;  %p37_p0 = scmp.ge.s32.totalorder %s35_s21, 2 }
   0x9   : > { %p276_p1 = scmp.ne.s32.totalorder %s1697_s15, %s1693_s14  ;;  %p277_p2 = scmp.eq.s32.totalorder %s1366_s19, 1 }
   0xa   : > { %p282_p3 = scmp.ne.s32.totalorder %s1693_s14, %s1689_s13  ;;  %s2076_s21 = smov (%p37_p0, %s35_s21), 0 }
   0xb   : > { %2066 = sst [smem:[#allocation7_spill]] %s2076_s21  ;;  %p1819_p4 = por %p277_p2, %p276_p1 }
   0xc   : > { %p283_p5 = scmp.eq.s32.totalorder %s1367_s20, 1  ;;  %s261_s24 = ssub.s32 %s1705_s17, %s2076_s21 }
   0xd   : > { %p1370_p6 = scmp.ge.s32.totalorder %s1709_s18, 1  ;;  %p264_p7 = scmp.eq.s32.totalorder %s261_s24, 0 }
   0xe   : > { %p1826_p8 = por %p283_p5, %p282_p3  ;;  %p342_p9 = scmp.lt.s32.totalorder %s1709_s18, 3 }
   0xf   : > { %s1832_s26 = scalar_select %p264_p7, %s1697_s15, %s266_s22  }
  0x10   : > { %p343_p10 = pnand %p1370_p6, %p342_p9 }
  0x11   : > { %s2069_s3 = sld [smem:[#allocation8_spill]] (!%p343_p10)  ;;  %v1711_v1 = vmov (!%p343_p10), 0.0   ;;  %vm1712_vm0 = vmmov (!%p343_p10), 0   ;;  %p386_p11 = scmp.lt.s32.totalorder (!%p343_p10), %s1701_s16, 1  ;;  %vm428_vm1 = vcmask (!%p343_p10), 261120   ;;  %v1600_v3 = vld [vmem:[%s2053_s2] sm:$0xff] (!%p343_p10)   ;;  %v480_v8 = vlaneseq (!%p343_p10) }
  0x12   : > { %346 = sbr.rel (%p343_p10) target bundleno = 2555 (0x9fb), region = 60  ;;  %1439 = vmatprep.subr.bf16.mxu1 (!%p343_p10), %v1711_v1  ;;  %1455 = vmatprep.subr.bf16.mxu0 (!%p343_p10), %v1711_v1  ;;  %v1601_v6 = vld [vmem:[%s2053_s2 + $0x8] sm:$0xff] (!%p343_p10)   ;;  %v1374_v10 = vld [vmem:[%s2059_s8] ss:$0 sm:$0xff] (!%p343_p10)  ;;  %vm473_vm2 = vcmask (!%p343_p10), 519168   ;;  %vm543_vm3 = vcmask (!%p343_p10), 64512  }
  0x13   : > { %1443 = vmatprep.mubr.msk.bf16.mxu1 (!%p343_p10), %vm1712_vm0, %v1711_v1  ;;  %1457 = vmatprep.mubr.msk.bf16.mxu0 (!%p343_p10), %vm1712_vm0, %v1711_v1  ;;  %v1874_v9 = vshrl.u32 (!%p343_p10), %v480_v8, 7  ;;  %v1883_v16 = vld [vmem:[%s2058_s7] sm:$0x7f] (!%p343_p10)  ;;  %s1713_s12 = smov (!%p343_p10), 112   ;;  %s1714_s19 = smov (!%p343_p10), 120   ;;  %vm610_vm4 = vcmask (!%p343_p10), 1043456  }
  0x14   : > { %s1717_s24 = smov (!%p343_p10), 80   ;;  %s1718_s27 = smov (!%p343_p10), 72   ;;  %vm1001_vm5 = vcmask (!%p343_p10), 130048   ;;  %vm1004_vm6 = vcmask (!%p343_p10), 195584   ;;  %vm1199_vm7 = vcmask (!%p343_p10), 523264  }
  0x15   : > { %v482_v14 = vsub.s32 (!%p343_p10), 0, %v1874_v9  ;;  %s1720_s21 = smov (!%p343_p10), 8  }
  0x17   : > { %v1598_v0 = vld [vmem:[%s2069_s3] sm:$0xff] (!%p343_p10)   ;;  %v1599_v2 = vld [vmem:[%s2069_s3 + $0x8] sm:$0xff] (!%p343_p10)   ;;  %v483_v19 = vrot.slane (!%p343_p10), %v1883_v16, %v482_v14 }
  0x18   : > { %1440 = vmatpush3.bf16.msra.mxu1 (!%p343_p10), %v1598_v0 }
  0x19   : > { %1441 = vmatprep.subr.bf16.mxu1 %v1711_v1  ;;  %s387_s11 = scalar_select %p386_p11, %s1701_s16, 1 }
  0x1b   : > { %s1372_s20 = sshll.u32 %s387_s11, 3  ;;  %s1373_s22 = sshll.u32 %s387_s11, 2 }
  0x1c   : > { %1442 = vmatpush3.bf16.msra.mxu1 %v1599_v2  ;;  %s392_s28 = scalar_lea.vmem %s2051_s0, %s1372_s20  ;;  %s396_s3 = scalar_lea.vmem %s2052_s1, %s1373_s22 }
  0x1d   : > { %1447 = vmatprep.subr.bf16.mxu1 %v1711_v1  ;;  %v1859_v4 = vld [vmem:[%s392_s28] sm:$0xff]  ;;  %s1715_s20 = smov 104   ;;  %s1716_s22 = smov 96  }
  0x1e   : > { %v404_v5 = vld [vmem:[%s396_s3] sm:$0xf]  ;;  %v475_v7 = vpack.c.bf16 %v1859_v4, %v1859_v4  ;;  %s1719_s28 = smov 88   ;;  %s1721_s11 = smov 16  }
  0x1f   : > { %1444 = vmatmul.mubr.msk.bf16.vlgmr.msra.gmra.mrb[0].mxu1 %vm428_vm1, %v404_v5 }
  0x20   : > { %1448 = vmatpush3.bf16.msra.mxu1 %v1600_v3  ;;  %1451 = vmatprep.mubr.msk.bf16.mxu1 %vm1712_vm0, %v1711_v1 }
  0x21   : > { %1449 = vmatprep.subr.bf16.mxu1 %v1711_v1 }
  0x24   : > { %1450 = vmatpush3.bf16.msra.mxu1 %v1601_v6 }
  0x25   : > { %1461 = vmatprep.subr.bf16.mxu1 %v1711_v1 }
  0x27   : > { %1452 = vmatmul.mubr.msk.bf16.vlgmr.msra.gmra.mrb[4].mxu1 %vm428_vm1, %v475_v7 }
  0x28   : > { %1463 = vmatprep.mubr.msk.bf16.mxu1 %vm1712_vm0, %v1711_v1 }
  0xf2   : > { %v466_v11 = vpop.f32.mrb[0].mxu1 }
  0xf3   : > { %v467_v12 = vadd.f32 %v1374_v10, %v466_v11  ;;  %v1445_v13 = vpop.f32.mrb[1].mxu1 }
  0xf4   : > { %v469_v15 = vpop.f32.mrb[2].mxu1 }
  0xf5   : > { %v472_v17 = vpack.c.bf16 %v467_v12, %v467_v12  ;;  %v1446_v18 = vpop.f32.mrb[3].mxu1 }
  0xf7   : > { %474 = vst.msk [vmem:[#allocation2] sm:$0xf] %vm473_vm2, %v472_v17 }
  0xfa   : > { %v534_v20 = vpop.f32.mrb[4].mxu1 }
  0xfb   : > { %v535_v21 = vadd.f32 %v534_v20, %v483_v19  ;;  %v1453_v22 = vpop.f32.mrb[5].mxu1 }
  0xfc   : > { %v537_v23 = vpop.f32.mrb[6].mxu1 }
  0xfd   : > { %v540_v24 = vmul.f32 0.35355338, %v535_v21  ;;  %v1454_v25 = vpop.f32.mrb[7].mxu1 }
  0xfe   : > { %v542_v26 = vld [vmem:[#allocation2] sm:$0xf] }
  0xff   : > { %v548_v27 = vsel %vm543_vm3, %v542_v26, 0  ;;  %v1887_v28 = vcombine.low %v542_v26, %v542_v26  ;;  %v541_v29 = vpack.c.bf16 %v540_v24, %v540_v24 }
 0x100   : > { %1456 = vmatpush3.bf16.xpose.msra.mxu0 %v548_v27 }
 0x101   : > { %769 = vrot.lane.b32.xlu1 %v1887_v28, %s1713_s12  ;;  %658 = vrot.lane.b32.xlu0 %v1887_v28, %s1714_s19 }
 0x102   : > { %1467 = vmatprep.subr.bf16.mxu0 %v1711_v1 }
 0x105   : > { %767 = vrot.lane.b32.xlu1 %v541_v29, %s1713_s12  ;;  %656 = vrot.lane.b32.xlu0 %v541_v29, %s1714_s19  ;;  %s1722_s12 = smov 24  }
 0x107   : > { %1458 = vmatmul.mubr.msk.bf16.vlgmr.msra.gmra.mrb[0].mxu0 %vm543_vm3, %v541_v29 }
 0x108   : > { %1469 = vmatprep.mubr.msk.bf16.mxu0 %vm1712_vm0, %v1711_v1 }
 0x109   : > { %878 = vrot.lane.b32.xlu1 %v541_v29, %s1715_s20  ;;  %880 = vrot.lane.b32.xlu0 %v1887_v28, %s1715_s20  ;;  %s383_s20 = sand.u32 1, %s1693_s14  }
 0x10a   : > { %s1269_s17 = scalar_lea.sflag [#allocation4], %s383_s20 }
 0x173   : > { %v659_v30 = vpop.permute.xlu0 %658  ;;  %v770_v32 = vpop.permute.xlu1 %769 }
 0x174   : > { %v664_v31 = vsel %vm543_vm3, %v659_v30, 0  ;;  %v775_v34 = vsel %vm543_vm3, %v770_v32, 0 }
 0x175   : > { %1468 = vmatpush3.bf16.xpose.msra.mxu0 %v664_v31 }
 0x176   : > { %1479 = vmatprep.subr.bf16.mxu0 %v1711_v1 }
 0x177   : > { %v657_v33 = vpop.permute.xlu0 %656  ;;  %v768_v36 = vpop.permute.xlu1 %767 }
 0x17b   : > { %v881_v35 = vpop.permute.xlu0 %880  ;;  %v879_v38 = vpop.permute.xlu1 %878 }
 0x17c   : > { %1470 = vmatmul.mubr.msk.bf16.vlgmr.msra.gmra.mrb[4].mxu0 %vm543_vm3, %v657_v33  ;;  %v886_v37 = vsel %vm543_vm3, %v881_v35, 0 }
 0x17d   : > { %1480 = vmatpush3.bf16.xpose.msra.mxu0 %v775_v34  ;;  %1481 = vmatprep.mubr.msk.bf16.mxu0 %vm1712_vm0, %v1711_v1 }
 0x17e   : > { %1491 = vmatprep.subr.bf16.mxu0 %v1711_v1 }
 0x184   : > { %1482 = vmatmul.mubr.msk.bf16.vlgmr.msra.gmra.mrb[8].mxu0 %vm543_vm3, %v768_v36 }
 0x185   : > { %1492 = vmatpush3.bf16.xpose.msra.mxu0 %v886_v37  ;;  %1493 = vmatprep.mubr.msk.bf16.mxu0 %vm1712_vm0, %v1711_v1 }
 0x186   : > { %1503 = vmatprep.subr.bf16.mxu0 %v1711_v1 }
 0x18c   : > { %1494 = vmatmul.mubr.msk.bf16.vlgmr.msra.gmra.mrb[12].mxu0 %vm543_vm3, %v879_v38 }
 0x18d   : > { %1507 = vmatprep.mubr.msk.bf16.mxu0 %vm1712_vm0, %v1711_v1 }
 0x1da   : > { %v584_v39 = vpop.f32.mrb[0].mxu0 }
 0x1db   : > { %v1459_v40 = vpop.f32.mrb[1].mxu0  ;;  %v590_v41 = vsel %vm543_vm3, %v584_v39, -inf }
 0x1dc   : > { %591 = vmax.xlane.f32.xlu0 %v590_v41  ;;  %v587_v42 = vpop.f32.mrb[2].mxu0 }
 0x1dd   : > { %v1460_v43 = vpop.f32.mrb[3].mxu0 }
 0x24f   : > { %v700_v44 = vpop.f32.mrb[4].mxu0 }
 0x250   : > { %v1471_v45 = vpop.f32.mrb[5].mxu0  ;;  %v706_v46 = vsel %vm543_vm3, %v700_v44, -inf }
 0x251   : > { %707 = vmax.xlane.f32.xlu1 %v706_v46  ;;  %v703_v47 = vpop.f32.mrb[6].mxu0 }
 0x252   : > { %v1472_v48 = vpop.f32.mrb[7].mxu0  ;;  %v1603_v47 = vld [vmem:[%s2055_s4] sm:$0xff]  }
 0x253   : > { %1504 = vmatpush3.bf16.msra.mxu0 %v1603_v47 }
 0x254   : > { %1505 = vmatprep.subr.bf16.mxu0 %v1711_v1 }
 0x257   : > { %v811_v49 = vpop.f32.mrb[8].mxu0 }
 0x258   : > { %v1483_v50 = vpop.f32.mrb[9].mxu0  ;;  %v817_v51 = vsel %vm543_vm3, %v811_v49, -inf }
 0x259   : > { %818 = vmax.xlane.f32.xlu0 %v817_v51  ;;  %v814_v52 = vpop.f32.mrb[10].mxu0 }
 0x25a   : > { %v1484_v53 = vpop.f32.mrb[11].mxu0 }
 0x25f   : > { %v922_v54 = vpop.f32.mrb[12].mxu0 }
 0x260   : > { %v1495_v55 = vpop.f32.mrb[13].mxu0  ;;  %v928_v56 = vsel %vm543_vm3, %v922_v54, -inf }
 0x261   : > { %929 = vmax.xlane.f32.xlu0 %v928_v56  ;;  %v925_v57 = vpop.f32.mrb[14].mxu0 }
 0x262   : > { %v1496_v58 = vpop.f32.mrb[15].mxu0 }
 0x269   : > { %v592_v59 = vpop.xlane.xlu0 %591 }
 0x26a   : > { %v593_v60 = vsub.f32 %v584_v39, %v592_v59 }
 0x26c   : > { %v594_v61 = vmul.f32 1.442695, %v593_v60 }
 0x26e   : > { %1611 = vpow2.f32 %v594_v61 }
 0x278   : > { %v1612_v62 = vpop.eup %1611 }
 0x279   : > { %v596_v63 = vsel %vm543_vm3, %v1612_v62, 0.0 }
 0x27a   : > { %597 = vadd.xlane.f32.xlu1 %v596_v63 }
 0x28b   : > { %605 = vrot.lane.b32.xlu1 %v1887_v28, %s1716_s22  ;;  %s1371_s22 = sshll.u32 %s383_s20, 3 }
 0x2de   : > { %v708_v0 = vpop.xlane.xlu1 %707 }
 0x2df   : > { %v709_v2 = vsub.f32 %v700_v44, %v708_v0 }
 0x2e1   : > { %v710_v3 = vmul.f32 1.442695, %v709_v2 }
 0x2e3   : > { %1613 = vpow2.f32 %v710_v3 }
 0x2e6   : > { %v819_v5 = vpop.xlane.xlu0 %818 }
 0x2e7   : > { %v820_v6 = vsub.f32 %v811_v49, %v819_v5  ;;  %v1604_v49 = vld [vmem:[%s2055_s4 + $0x8] sm:$0xff]  }
 0x2e8   : > { %1506 = vmatpush3.bf16.msra.mxu0 %v1604_v49 }
 0x2e9   : > { %v821_v7 = vmul.f32 1.442695, %v820_v6  ;;  %1519 = vmatprep.subr.bf16.mxu0 %v1711_v1 }
 0x2eb   : > { %1615 = vpow2.f32 %v821_v7 }
 0x2ed   : > { %v1614_v8 = vpop.eup %1613 }
 0x2ee   : > { %v930_v10 = vpop.xlane.xlu0 %929  ;;  %v712_v11 = vsel %vm543_vm3, %v1614_v8, 0.0 }
 0x2ef   : > { %v931_v12 = vsub.f32 %v922_v54, %v930_v10  ;;  %713 = vadd.xlane.f32.xlu0 %v712_v11  ;;  %v1013_v10 = vsub.s32 1, %v1874_v9 }
 0x2f1   : > { %v932_v13 = vmul.f32 1.442695, %v931_v12  ;;  %v1014_v11 = vrot.slane %v1883_v16, %v1013_v10 }
 0x2f3   : > { %1617 = vpow2.f32 %v932_v13 }
 0x2f5   : > { %v1616_v14 = vpop.eup %1615 }
 0x2f6   : > { %v823_v15 = vsel %vm543_vm3, %v1616_v14, 0.0 }
 0x2f7   : > { %824 = vadd.xlane.f32.xlu1 %v823_v15 }
 0x2fd   : > { %v1618_v17 = vpop.eup %1617 }
 0x2fe   : > { %v934_v18 = vsel %vm543_vm3, %v1618_v17, 0.0 }
 0x2ff   : > { %935 = vadd.xlane.f32.xlu0 %v934_v18 }
 0x307   : > { %v598_v19 = vpop.xlane.xlu1 %597 }
 0x308   : > { %1619 = vrcp.f32 %v598_v19  ;;  %829 = vrot.lane.b32.xlu1 %v1887_v28, %s1717_s24  ;;  %s1403_s24 = sshll.u32 %s1701_s16, 7  ;;  %s1723_s16 = smov [#allocation3]  }
 0x309   : > { %s2003_s3 = scalar_lea.hbm %s2061_s10, %s1403_s24 }
 0x30b   : > { %v606_v20 = vpop.permute.xlu1 %605 }
 0x30c   : > { %v612_v21 = vsel %vm610_vm4, %v606_v20, 0  ;;  %940 = vrot.lane.b32.xlu1 %v1887_v28, %s1718_s27  ;;  %s385_s27 = scalar_lea.vmem [#allocation3], %s1371_s22 }
 0x30d   : > { %1462 = vmatpush3.bf16.msra.mxu1 %v612_v21 }
 0x30e   : > { %1473 = vmatprep.subr.bf16.mxu1 %v1711_v1 }
 0x312   : > { %v1620_v22 = vpop.eup %1619 }
 0x313   : > { %v600_v23 = vmul.f32 %v1620_v22, %v1612_v62 }
 0x315   : > { %718 = vrot.lane.b32.xlu0 %v1887_v28, %s1719_s28  ;;  %v601_v24 = vpack.c.bf16 %v600_v23, %v600_v23  ;;  %s1283_s28 = sshll.u32 %s385_s27, 4  ;;  %s2005_s28 = int_to_ptr.vmem [resolvable:$true] %s1283_s28 }
 0x317   : > { %1464 = vmatmul.mubr.msk.bf16.vlgmr.msra.gmra.mrb[8].mxu1 %vm543_vm3, %v601_v24 }
 0x318   : > { %1475 = vmatprep.mubr.msk.bf16.mxu1 %vm1712_vm0, %v1711_v1 }
 0x37c   : > { %v714_v25 = vpop.xlane.xlu0 %713 }
 0x37d   : > { %1621 = vrcp.f32 %v714_v25  ;;  %v1605_v25 = vld [vmem:[%s2056_s5] sm:$0xff]  }
 0x384   : > { %v825_v26 = vpop.xlane.xlu1 %824 }
 0x385   : > { %1623 = vrcp.f32 %v825_v26  ;;  %v1606_v26 = vld [vmem:[%s2056_s5 + $0x8] sm:$0xff]  }
 0x387   : > { %v1622_v27 = vpop.eup %1621 }
 0x388   : > { %v716_v30 = vmul.f32 %v1622_v27, %v1614_v8  ;;  %v830_v33 = vpop.permute.xlu1 %829  ;;  %v1608_v27 = vld [vmem:[%s2057_s6 + $0x8] sm:$0xff]  }
 0x389   : > { %v835_v35 = vsel %vm610_vm4, %v830_v33, 0  ;;  %v1091_v33 = vsub.s32 3, %v1874_v9 }
 0x38a   : > { %v717_v28 = vpack.c.bf16 %v716_v30, %v716_v30 }
 0x38c   : > { %v936_v29 = vpop.xlane.xlu0 %935  ;;  %v941_v37 = vpop.permute.xlu1 %940 }
 0x38d   : > { %1625 = vrcp.f32 %v936_v29  ;;  %v946_v40 = vsel %vm610_vm4, %v941_v37, 0 }
 0x38f   : > { %v1624_v34 = vpop.eup %1623 }
 0x390   : > { %v719_v31 = vpop.permute.xlu0 %718  ;;  %v827_v36 = vmul.f32 %v1624_v34, %v1616_v14 }
 0x391   : > { %v724_v32 = vsel %vm610_vm4, %v719_v31, 0 }
 0x392   : > { %1474 = vmatpush3.bf16.msra.mxu1 %v724_v32  ;;  %v828_v38 = vpack.c.bf16 %v827_v36, %v827_v36  ;;  %v1086_v32 = vsub.s32 2, %v1874_v9  ;;  %v1092_v36 = vrot.slane %v1883_v16, %v1091_v33 }
 0x393   : > { %1485 = vmatprep.subr.bf16.mxu1 %v1711_v1 }
 0x395   : > { %1476 = vmatmul.mubr.msk.bf16.vlgmr.msra.gmra.mrb[12].mxu1 %vm543_vm3, %v717_v28  ;;  %v1087_v28 = vrot.slane %v1883_v16, %v1086_v32 }
 0x396   : > { %1486 = vmatpush3.bf16.msra.mxu1 %v835_v35  ;;  %1487 = vmatprep.mubr.msk.bf16.mxu1 %vm1712_vm0, %v1711_v1 }
 0x397   : > { %1497 = vmatprep.subr.bf16.mxu1 %v1711_v1  ;;  %v1626_v39 = vpop.eup %1625 }
 0x398   : > { %v938_v41 = vmul.f32 %v1626_v39, %v1618_v17 }
 0x39a   : > { %v939_v42 = vpack.c.bf16 %v938_v41, %v938_v41  ;;  %v1610_v41 = vld [vmem:[%s2057_s6 + $0x18] sm:$0xff]  }
 0x39d   : > { %1488 = vmatmul.mubr.msk.bf16.vlgmr.msra.gmra.mrb[16].mxu1 %vm543_vm3, %v828_v38 }
 0x39e   : > { %1498 = vmatpush3.bf16.msra.mxu1 %v946_v40  ;;  %1499 = vmatprep.mubr.msk.bf16.mxu1 %vm1712_vm0, %v1711_v1  ;;  %v1609_v40 = vld [vmem:[%s2057_s6 + $0x10] sm:$0xff]  }
 0x39f   : > { %1511 = vmatprep.subr.bf16.mxu1 %v1711_v1 }
 0x3a5   : > { %1500 = vmatmul.mubr.msk.bf16.vlgmr.msra.gmra.mrb[20].mxu1 %vm543_vm3, %v939_v42  ;;  %v1393_v42 = vld [vmem:[%s2060_s9] ss:$0 sm:$0xff] }
 0x3a6   : > { %1515 = vmatprep.mubr.msk.bf16.mxu1 %vm1712_vm0, %v1711_v1  ;;  %1512 = vmatpush3.bf16.msra.mxu1 %v1605_v25 }
 0x3a7   : > { %1513 = vmatprep.subr.bf16.mxu1 %v1711_v1 }
 0x3aa   : > { %1514 = vmatpush3.bf16.msra.mxu1 %v1606_v26 }
 0x3ea   : > { %v648_v43 = vpop.f32.mrb[8].mxu1 }
 0x3eb   : > { %v1465_v44 = vpop.f32.mrb[9].mxu1  ;;  %v654_v2 = vpack.c.bf16 %v648_v43, %v648_v43 }
 0x3ec   : > { %v651_v45 = vpop.f32.mrb[10].mxu1 }
 0x3ed   : > { %v1466_v46 = vpop.f32.mrb[11].mxu1 }
 0x468   : > { %v760_v48 = vpop.f32.mrb[12].mxu1 }
 0x469   : > { %v766_v50 = vpack.c.bf16 %v760_v48, %v760_v48  ;;  %v1477_v51 = vpop.f32.mrb[13].mxu1 }
 0x46a   : > { %v763_v52 = vpop.f32.mrb[14].mxu1 }
 0x46b   : > { %990 = vrot.lane.b32.xlu0 %v766_v50, %s1720_s21  ;;  %v1478_v53 = vpop.f32.mrb[15].mxu1  ;;  %s1631_s21 = scalar_lea.vmem %s2005_s28, 128 }
 0x46c   : > { %p1632_p12 = scmp.ne.s32.totalorder %s2005_s28, %s1631_s21 }
 0x46e   : > { %p1633_p13 = pnand %p1632_p12, %p1819_p4 }
 0x470   : > { %v871_v54 = vpop.f32.mrb[16].mxu1  ;;  %p1634_p0 = pneg %p1633_p13 }
 0x471   : > { %v877_v55 = vpack.c.bf16 %v871_v54, %v871_v54  ;;  %v1489_v56 = vpop.f32.mrb[17].mxu1 }
 0x472   : > { %v874_v57 = vpop.f32.mrb[18].mxu1 }
 0x473   : > { %993 = vrot.lane.b32.xlu1 %v877_v55, %s1721_s11  ;;  %v1490_v58 = vpop.f32.mrb[19].mxu1  ;;  %s1635_s11 = sshll.u32 %s1723_s16, 4  ;;  %s1636_s11 = int_to_ptr.vmem [resolvable:$false] %s1635_s11 }
 0x474   : > { %p1638_p1 = scmp.lt.s32.totalorder %s2005_s28, %s1636_s11 }
 0x478   : > { %v982_v59 = vpop.f32.mrb[20].mxu1 }
 0x479   : > { %v988_v60 = vpack.c.bf16 %v982_v59, %v982_v59  ;;  %v1501_v61 = vpop.f32.mrb[21].mxu1 }
 0x47a   : > { %v985_v62 = vpop.f32.mrb[22].mxu1 }
 0x47b   : > { %996 = vrot.lane.b32.xlu0 %v988_v60, %s1722_s12  ;;  %v1502_v63 = vpop.f32.mrb[23].mxu1  ;;  %s1637_s12 = scalar_lea.vmem %s1636_s11, 256 }
 0x47c   : > { %p1639_p2 = scmp.lt.s32.totalorder %s1637_s12, %s1631_s21 }
 0x47e   : > { %p1640_p3 = por %p1639_p2, %p1638_p1 }
 0x480   : > { %p1641_p5 = pnand %p1640_p3, %p1634_p0 }
 0x4dd   : > { %v991_v0 = vpop.permute.xlu0 %990 }
 0x4de   : > { %v1000_v5 = vsel %vm543_vm3, %v654_v2, %v991_v0 }
 0x4e5   : > { %v994_v3 = vpop.permute.xlu1 %993 }
 0x4e6   : > { %v1003_v6 = vsel %vm1001_vm5, %v1000_v5, %v994_v3  ;;  %v1259_v3 = vsub.s32 5, %v1874_v9  ;;  %v1264_v5 = vsub.s32 6, %v1874_v9 }
 0x4e8   : > { %v1265_v10 = vrot.slane %v1883_v16, %v1264_v5 }
 0x4ed   : > { %v997_v7 = vpop.permute.xlu0 %996 }
 0x4ee   : > { %v1006_v8 = vsel %vm1004_vm6, %v1003_v6, %v997_v7  ;;  %v1260_v6 = vrot.slane %v1883_v16, %v1259_v3 }
 0x4ef   : > { %1508 = vmatmul.mubr.msk.bf16.vlgmr.msra.gmra.mrb[16].mxu0 %vm428_vm1, %v1006_v8 }
 0x4f0   : > { %1527 = vmatprep.mubr.msk.bf16.mxu0 %vm1712_vm0, %v1711_v1 }
 0x5c2   : > { %v1063_v12 = vpop.f32.mrb[16].mxu0 }
 0x5c3   : > { %v1064_v13 = vadd.f32 %v1063_v12, %v1014_v11  ;;  %v1509_v14 = vpop.f32.mrb[17].mxu0 }
 0x5c4   : > { %v1066_v15 = vpop.f32.mrb[18].mxu0 }
 0x5c5   : > { %v1510_v17 = vpop.f32.mrb[19].mxu0  ;;  %v1069_v18 = vadd.f32 %v1064_v13, %v1859_v4  ;;  %v1607_v4 = vld [vmem:[%s2057_s6] sm:$0xff]  }
 0x5c6   : > { %1520 = vmatpush3.bf16.msra.mxu0 %v1607_v4 }
 0x5c7   : > { %v1070_v19 = vsel %vm428_vm1, %v1069_v18, 0.0  ;;  %1521 = vmatprep.subr.bf16.mxu0 %v1711_v1 }
 0x5c8   : > { %1071 = vadd.xlane.f32.xlu1 %v1070_v19 }
 0x5ca   : > { %1522 = vmatpush3.bf16.msra.mxu0 %v1608_v27 }
 0x5cb   : > { %1523 = vmatprep.subr.bf16.mxu0 %v1711_v1 }
 0x5ce   : > { %1524 = vmatpush3.bf16.msra.mxu0 %v1609_v40 }
 0x5cf   : > { %1525 = vmatprep.subr.bf16.mxu0 %v1711_v1  ;;  %v1173_v1 = vsub.s32 4, %v1874_v9 }
 0x5d1   : > { %v1174_v50 = vrot.slane %v1883_v16, %v1173_v1 }
 0x5d2   : > { %1526 = vmatpush3.bf16.msra.mxu0 %v1610_v41 }
 0x655   : > { %v1072_v20 = vpop.xlane.xlu1 %1071 }
 0x656   : > { %v1074_v21 = vmul.f32 0.03125, %v1072_v20 }
 0x658   : > { %v1075_v22 = vsub.f32 %v1069_v18, %v1074_v21 }
 0x65a   : > { %v1076_v23 = vmul.f32 %v1075_v22, %v1075_v22 }
 0x65c   : > { %v1077_v24 = vsel %vm428_vm1, %v1076_v23, 0.0 }
 0x65d   : > { %1078 = vadd.xlane.f32.xlu0 %v1077_v24 }
 0x6ea   : > { %v1079_v29 = vpop.xlane.xlu0 %1078 }
 0x6eb   : > { %v1080_v30 = vmul.f32 0.03125, %v1079_v29 }
 0x6ed   : > { %v1081_v31 = vadd.f32 1e-05, %v1080_v30 }
 0x6ef   : > { %1627 = vrsqrt.f32 %v1081_v31 }
 0x6f9   : > { %v1628_v34 = vpop.eup %1627 }
 0x6fa   : > { %v1083_v35 = vmul.f32 %v1628_v34, %v1075_v22 }
 0x6fc   : > { %v1088_v37 = vmul.f32 %v1087_v28, %v1083_v35 }
 0x6fe   : > { %v1093_v38 = vadd.f32 %v1092_v36, %v1088_v37 }
 0x700   : > { %v1094_v39 = vpack.c.bf16 %v1093_v38, %v1093_v38 }
 0x702   : > { %1516 = vmatmul.mubr.msk.bf16.vlgmr.msra.gmra.mrb[24].mxu1 %vm428_vm1, %v1094_v39 }
 0x7d5   : > { %v1155_v43 = vpop.f32.mrb[24].mxu1 }
 0x7d6   : > { %v1156_v44 = vadd.f32 %v1393_v42, %v1155_v43  ;;  %v1517_v45 = vpop.f32.mrb[25].mxu1 }
 0x7d7   : > { %v1158_v46 = vpop.f32.mrb[26].mxu1 }
 0x7d8   : > { %v1161_v47 = vmax.f32 %v1156_v44, 0.0  ;;  %v1518_v48 = vpop.f32.mrb[27].mxu1 }
 0x7da   : > { %v1162_v49 = vpack.c.bf16 %v1161_v47, %v1161_v47 }
 0x7dc   : > { %1528 = vmatmul.mubr.msk.bf16.vlgmr.msra.gmra.mrb[20].mxu0 %vm1199_vm7, %v1162_v49 }
 0x8af   : > { %v1237_v51 = vpop.f32.mrb[20].mxu0 }
 0x8b0   : > { %v1238_v52 = vadd.f32 %v1237_v51, %v1174_v50  ;;  %v1529_v53 = vpop.f32.mrb[21].mxu0 }
 0x8b1   : > { %v1240_v54 = vpop.f32.mrb[22].mxu0 }
 0x8b2   : > { %v1530_v55 = vpop.f32.mrb[23].mxu0  ;;  %v1243_v56 = vadd.f32 %v1238_v52, %v1093_v38 }
 0x8b4   : > { %v1244_v57 = vsel %vm428_vm1, %v1243_v56, 0.0 }
 0x8b5   : > { %1245 = vadd.xlane.f32.xlu0 %v1244_v57 }
 0x942   : > { %v1246_v58 = vpop.xlane.xlu0 %1245 }
 0x943   : > { %v1247_v59 = vmul.f32 0.03125, %v1246_v58 }
 0x945   : > { %v1248_v60 = vsub.f32 %v1243_v56, %v1247_v59 }
 0x947   : > { %v1249_v61 = vmul.f32 %v1248_v60, %v1248_v60 }
 0x949   : > { %v1250_v62 = vsel %vm428_vm1, %v1249_v61, 0.0 }
 0x94a   : > { %1251 = vadd.xlane.f32.xlu1 %v1250_v62 }
 0x9d7   : > { %v1252_v63 = vpop.xlane.xlu1 %1251 }
 0x9d8   : > { %v1253_v0 = vmul.f32 0.03125, %v1252_v63 }
 0x9da   : > { %v1254_v2 = vadd.f32 1e-05, %v1253_v0 }
 0x9dc   : > { %1629 = vrsqrt.f32 %v1254_v2 }
 0x9e6   : > { %v1630_v7 = vpop.eup %1629 }
 0x9e7   : > { %v1256_v8 = vmul.f32 %v1630_v7, %v1248_v60 }
 0x9e9   : > { %v1261_v11 = vmul.f32 %v1260_v6, %v1256_v8 }
 0x9eb   : > { %v1266_v12 = vadd.f32 %v1265_v10, %v1261_v11 }
 0x9ed   : > { %1267 = vst.msk [vmem:[%s385_s27] sm:$0xff] %vm428_vm1, %v1266_v12 }
 0x9ee   : > { %1644 = shalt.err (!%p1641_p5)
}
 0x9ef   : > { %s1645_s19 = scalar_lea.hbm %s2003_s3, 128  ;;  %s1649_s24 = scalar_lea.hbm %s2061_s10, 256 }
 0x9f0   : > { %p1646_p6 = scmp.ne.s32.totalorder %s2003_s3, %s1645_s19  ;;  %p1650_p10 = scmp.lt.u32.totalorder %s2003_s3, %s2061_s10 }
 0x9f1   : > { %p1651_p11 = scmp.lt.u32.totalorder %s1649_s24, %s1645_s19  ;;  %p1653_p13 = scmp.lt.u32.totalorder %s1645_s19, %s2003_s3 }
 0x9f2   : > { %p1647_p7 = pnand %p1646_p6, %p1819_p4 }
 0x9f3   : > { %p1652_p12 = por %p1651_p11, %p1650_p10 }
 0x9f4   : > { %p1648_p9 = pneg %p1647_p7 }
 0x9f5   : > { %p1654_p0 = por %p1653_p13, %p1652_p12 }
 0x9f7   : > { %p1655_p1 = pnand %p1654_p0, %p1648_p9 }
 0x9f9   : > { %1658 = shalt.err (!%p1655_p1)
}
 0x9fa   : > { %1531 = dma.vmem_to_hbm [thread:$0]  (%p1819_p4), %s2005_s28, 128, %s2003_s3, %s1269_s17  }
 0x9fb PF: > { %p1537_p2 = scmp.ge.s32.totalorder %s1709_s18, 2  ;;  %s1295_s30 = sand.u32 1, %s1689_s13  }
 0x9fc   : > { %s1296_s21 = scalar_lea.sflag [#allocation4], %s1295_s30 }
 0x9fd   : > { %p1534_p3 = pnand %p1537_p2, %p1826_p8 }
 0x9ff   : > { %1684 = dma.done.wait (!%p1534_p3), %s1296_s21, 128  }
 0xa00   : > { %1686 = vsyncadd (!%p1534_p3), %s1296_s21, 4294967168  ;;  %s23_s18 = sadd.s32 1, %s1709_s18   ;;  %s2070_s16 = sld [smem:[#allocation6_spill]] }
 0xa01   : > { %p20_p5 = scmp.ge.s32.totalorder %s23_s18, 4   ;;  %s2071_s17 = sld [smem:[#allocation7_spill]] }
 0xa02   : > { %s2072_s13 = smov %s1693_s14  ;;  %s2073_s14 = smov %s1697_s15 }
 0xa03   : > { %s2074_s15 = smov %s1832_s26  ;;  %22 = sbr.rel (!%p20_p5) target bundleno = 6 (0x6), region = 102 }
 0xa0a   :  { %1301 = vsyncpa [#allocation4], 1 }
 0xa0b   :  { %1303 = vsyncpa [#allocation4 + $0x1], 1 }

</bundles_post_ra>
